<compile_context>
chip_gen: v7x
topology: tpu7x:2x2x1
jax: 0.10.0
libtpu: 0.0.40
codegen_flags: <defaults>
</compile_context>

<pallas_src>
import functools

import numpy as np
import jax
import jax.numpy as jnp
from jax.experimental import pallas as pl
from jax.experimental.pallas import tpu as pltpu


# ----------------------------------------------------------------------------
# Pallas kernel: whole LSTM recurrence + fused FF head in one invocation.
# Everything fits comfortably in VMEM (<1 MiB); the serial time loop is fully
# unrolled so adjacent steps' MXU/EUP/VPU/store work can overlap.
# ----------------------------------------------------------------------------
def _lstm_classifier_kernel(x_ref,        # (T*Bp, 1)  f32  time-major token values, batch-padded
                            wih_ref,      # (1, 4G)    f32  W_ih row (input_dim == 1), gate-blocked
                            bias_ref,     # (1, 4G)    f32  b_ih + b_hh, gate-blocked
                            whh_t_ref,    # (G, 4G)    bf16 W_hh^T, zero-padded per gate block
                            w_fused_ref,  # (G, Lp)    f32  (hidden2ff @ ff2label)^T, zero-padded
                            b_fused_ref,  # (1, Lp)    f32  fused bias
                            out_ref,      # (T*Bp, Lp) f32  sigmoid(logits), lane-dense
                            gx_ref,       # (T*Bp, 4G) f32  scratch: x*W_ih + bias for all steps
                            *, seq_len, batch_pad):
    G = whh_t_ref.shape[0]                         # padded hidden width (128)

    # Input-gate contribution for ALL timesteps, computed in-kernel with one
    # broadcast multiply-add (VPU work off the serial recurrence path).
    gx_ref[...] = x_ref[...] * wih_ref[...] + bias_ref[...]

    # Hoisted weight loads (avoid per-iteration re-loads / re-broadcasts).
    whh_t = whh_t_ref[...]
    w_fused = w_fused_ref[...]
    b_fused = b_fused_ref[...]

    # NOTE: padded batch rows (Bp > B) evolve nonzero, bias-driven h/c values.
    # This is safe ONLY because nothing reduces across the batch/sublane axis
    # and the wrapper slices those rows off.  Padded hidden lanes (cols H:G)
    # stay exactly zero (weights/biases are zero-padded there).
    c = jnp.zeros((batch_pad, G), jnp.float32)      # cell state (f32)
    h_bf = jnp.zeros((batch_pad, G), jnp.bfloat16)  # recurrent-matmul operand (bf16)

    # Fully unrolled serial recurrence (seq_len is static & small): gives the
    # scheduler cross-iteration visibility so adjacent steps overlap.
    for t in range(seq_len):
        g_in = gx_ref[t * batch_pad:(t + 1) * batch_pad, :]          # static full-tile slab
        if t == 0:
            gates = g_in                                             # h0 == 0: matmul elided
        else:
            # bf16 operands, f32 accumulate.  Error compounds with T; at T=8 it
            # stays well under atol=2e-2.  For long sequences keep h in f32 here.
            gates = g_in + jnp.dot(h_bf, whh_t,
                                   preferred_element_type=jnp.float32)
        # Lane-tile-aligned gate slices (each exactly one 128-lane block).
        # Elementwise / transcendental math stays f32 (v5e has no bf16 VPU/EUP).
        i_g = jax.nn.sigmoid(gates[:, 0 * G:1 * G])
        f_g = jax.nn.sigmoid(gates[:, 1 * G:2 * G])
        g_g = jnp.tanh(gates[:, 2 * G:3 * G])
        o_g = jax.nn.sigmoid(gates[:, 3 * G:4 * G])
        c = f_g * c + i_g * g_g
        h = o_g * jnp.tanh(c)

        # Fused FF head applied per timestep: this MXU matmul + EUP sigmoid +
        # lane-dense store run on slots otherwise idle while step t+1's serial
        # recurrence is in flight, so the old epilogue disappears.
        out_ref[t * batch_pad:(t + 1) * batch_pad, :] = jax.nn.sigmoid(
            jnp.dot(h, w_fused, preferred_element_type=jnp.float32) + b_fused)

        h_bf = h.astype(jnp.bfloat16)

    # TODO(synk): nn.Dropout is identity at inference; training-mode dropout not implemented.


# ----------------------------------------------------------------------------
# Forward factory: all weight padding / transposes / fusion happen ONCE here,
# then are closed over by the jitted per-call forward (constant-folded by XLA).
# ----------------------------------------------------------------------------
def make_lstm_classifier_forward(params, *, batch_pad=8):
    f32 = jnp.float32
    H = params["whh"].shape[1]
    F = params["w1"].shape[0]
    L = params["w2"].shape[0]

    G = 128                       # per-gate lane block (>= H)
    Lp = 128                      # padded label width (lane-dense output)
    Bp = int(batch_pad)           # batch padded to a full sublane tile
    assert H <= G and L <= Lp and F <= G

    # --- LSTM weights: gate-blocked, lane-padded, right-multiply form --------
    wih = params["wih"].reshape(4, H).astype(f32)                     # input_dim == 1
    wih_p = jnp.zeros((4, G), f32).at[:, :H].set(wih).reshape(1, 4 * G)
    bias = (params["b_ih"] + params["b_hh"]).reshape(4, H).astype(f32)
    bias_p = jnp.zeros((4, G), f32).at[:, :H].set(bias).reshape(1, 4 * G)

    whh = params["whh"].reshape(4, H, H).astype(f32)                  # (gate, out, in)
    whh_t_p = (jnp.zeros((G, 4, G), f32)
               .at[:H, :, :H].set(jnp.transpose(whh, (2, 0, 1)))      # (in, gate, out)
               .reshape(G, 4 * G)
               .astype(jnp.bfloat16))                                 # bf16 recurrent operand

    # --- FF head: exact algebraic fusion (no nonlinearity between the layers) -
    w1_t = params["w1"].T.astype(f32)                                 # (H, F)
    w2_t = params["w2"].T.astype(f32)                                 # (F, L)
    w_fused = jnp.zeros((G, Lp), f32).at[:H, :L].set(w1_t @ w2_t)
    b_fused = jnp.zeros((1, Lp), f32).at[0, :L].set(
        params["b1"].astype(f32) @ w2_t + params["b2"].astype(f32))

    # Materialize the prepared constants once (off the per-call path).
    wih_p, bias_p, whh_t_p, w_fused, b_fused = jax.block_until_ready(
        (wih_p, bias_p, whh_t_p, w_fused, b_fused))

    @jax.jit
    def forward(x, mask):
        """x: (B, T) token values; mask unused (as in the PyTorch forward).
        Returns (B, T, label_size) float32."""
        del mask
        B, T = x.shape
        assert B <= Bp

        # Time-major, batch-padded token column (tiny; data-dependent, so it
        # stays in the per-call path — the big gx precompute moved in-kernel).
        x_tm = (jnp.zeros((T, Bp), f32).at[:, :B].set(x.astype(f32).T)
                .reshape(T * Bp, 1))

        # Advisory cost estimate so XLA can overlap this small latency-bound call.
        flops = (2 * (T - 1) * Bp * G * (4 * G)        # recurrent matmuls
                 + 2 * T * Bp * G * Lp                 # fused head matmuls
                 + 2 * T * Bp * 4 * G)                 # in-kernel gx mul-add
        transcendentals = T * Bp * (5 * G + Lp)
        bytes_accessed = (x_tm.size * 4 + wih_p.size * 4 + bias_p.size * 4
                          + whh_t_p.size * 2 + w_fused.size * 4 + b_fused.size * 4
                          + T * Bp * Lp * 4)

        # NOTE: a batch-parallel grid (to use v7x's 2nd TensorCore) is
        # intentionally omitted: at Bp = 8 (one sublane tile) there is nothing
        # to split; revisit with a ("parallel",) batch grid axis for large B.
        out_2d = pl.pallas_call(
            functools.partial(_lstm_classifier_kernel, seq_len=T, batch_pad=Bp),
            out_shape=jax.ShapeDtypeStruct((T * Bp, Lp), jnp.float32),
            in_specs=[pl.BlockSpec(memory_space=pltpu.MemorySpace.VMEM)] * 6,
            out_specs=pl.BlockSpec(memory_space=pltpu.MemorySpace.VMEM),
            scratch_shapes=[pltpu.VMEM((T * Bp, 4 * G), jnp.float32)],
            cost_estimate=pl.CostEstimate(flops=flops,
                                          transcendentals=transcendentals,
                                          bytes_accessed=bytes_accessed),
        )(x_tm, wih_p, bias_p, whh_t_p, w_fused, b_fused)

        # (T*Bp, Lp) -> (B, T, L)
        out = out_2d.reshape(T, Bp, Lp)[:, :B, :L]
        return jnp.transpose(out, (1, 0, 2))

    return forward


# ----------------------------------------------------------------------------
# Deterministic parameter init (same shapes as the PyTorch module's __init__)
# ----------------------------------------------------------------------------
def init_params(key, input_dim, hidden_dim, label_size):
    ff_dim = int(np.sqrt(hidden_dim))
    ks = jax.random.split(key, 8)
    s_lstm = 1.0 / np.sqrt(hidden_dim)
    s_ff1 = 1.0 / np.sqrt(hidden_dim)
    s_ff2 = 1.0 / np.sqrt(ff_dim)
    u = lambda k, shape, s: jax.random.uniform(k, shape, jnp.float32, -s, s)
    return {
        "wih": u(ks[0], (4 * hidden_dim, input_dim), s_lstm),   # LSTMCell weight_ih
        "whh": u(ks[1], (4 * hidden_dim, hidden_dim), s_lstm),  # LSTMCell weight_hh
        "b_ih": u(ks[2], (4 * hidden_dim,), s_lstm),
        "b_hh": u(ks[3], (4 * hidden_dim,), s_lstm),
        "w1": u(ks[4], (ff_dim, hidden_dim), s_ff1),            # hidden2ff
        "b1": u(ks[5], (ff_dim,), s_ff1),
        "w2": u(ks[6], (label_size, ff_dim), s_ff2),            # ff2label
        "b2": u(ks[7], (label_size,), s_ff2),
    }


# ----------------------------------------------------------------------------
# Pure-JAX (f32) reference of the PyTorch forward (for correctness check)
# ----------------------------------------------------------------------------
def reference_forward(x, params):
    B, T = x.shape
    H = params["whh"].shape[1]
    xf = x.astype(jnp.float32)[..., None]                  # (B, T, 1)
    h = jnp.zeros((B, H), jnp.float32)
    c = jnp.zeros((B, H), jnp.float32)
    outs = []
    for t in range(T):
        gates = (xf[:, t] @ params["wih"].T + params["b_ih"]
                 + h @ params["whh"].T + params["b_hh"])
        i, f, g, o = jnp.split(gates, 4, axis=1)
        i, f, g, o = jax.nn.sigmoid(i), jax.nn.sigmoid(f), jnp.tanh(g), jax.nn.sigmoid(o)
        c = f * c + i * g
        h = o * jnp.tanh(c)
        outs.append(h)
    pred = jnp.stack(outs, axis=1)                         # (B, T, H)
    pred = pred @ params["w1"].T + params["b1"]
    pred = jax.nn.sigmoid(pred @ params["w2"].T + params["b2"])
    return pred


if __name__ == "__main__":
    # Small shapes consistent with the module: input_dim=1 (forward unsqueezes x),
    # hidden_dim=64 -> ff_dim=8, label_size=6, batch=4, seq=8, n_tokens=16.
    input_dim, hidden_dim, label_size, n_tokens = 1, 64, 6, 16
    B, T = 4, 8

    key = jax.random.PRNGKey(0)
    k_par, k_x = jax.random.split(key)
    params = init_params(k_par, input_dim, hidden_dim, label_size)

    # Weight prep happens ONCE here; the returned jitted forward only runs the
    # Pallas kernel + tiny input/output reshapes per call.
    forward = make_lstm_classifier_forward(params)

    x = jax.random.randint(k_x, (B, T), 0, n_tokens).astype(jnp.float32)  # token values
    mask = jnp.ones((B, T), jnp.float32)                                  # unused

    out = jax.block_until_ready(forward(x, mask))

    ref = reference_forward(x, params)
    assert out.shape == (B, T, label_size), out.shape
    # Tolerance loosened vs. the pure-f32 path: the recurrent matmul runs in
    # bf16 (f32 accumulate); post-sigmoid outputs agree to well under 2e-2.
    np.testing.assert_allclose(np.asarray(out), np.asarray(ref), rtol=0.0, atol=2e-2)

    print("KERNEL_OK")
</pallas_src>

<mosaic_0001>
module attributes {stable_mosaic.version = 11 : i64} {
  func.func @_lstm_classifier_kernel(%arg0: memref<64x1xf32, #tpu.memory_space<vmem>>, %arg1: memref<1x512xf32, #tpu.memory_space<vmem>>, %arg2: memref<1x512xf32, #tpu.memory_space<vmem>>, %arg3: memref<128x512xbf16, #tpu.memory_space<vmem>>, %arg4: memref<128x128xf32, #tpu.memory_space<vmem>>, %arg5: memref<1x128xf32, #tpu.memory_space<vmem>>, %arg6: memref<64x128xf32, #tpu.memory_space<vmem>>, %arg7: memref<64x512xf32, #tpu.memory_space<vmem>>) attributes {dimension_semantics = [], scalar_prefetch = 0 : i64, scratch_operands = 1 : i64, tpu.core_type = #tpu.core_type<tc>} {
    %c0 = arith.constant 0 : index
    %c0_0 = arith.constant 0 : index
    %0 = vector.load %arg0[%c0, %c0_0] : memref<64x1xf32, #tpu.memory_space<vmem>>, vector<64x1xf32>
    %c0_1 = arith.constant 0 : index
    %c0_2 = arith.constant 0 : index
    %1 = vector.load %arg1[%c0_1, %c0_2] : memref<1x512xf32, #tpu.memory_space<vmem>>, vector<1x512xf32>
    %2 = vector.broadcast %0 : vector<64x1xf32> to vector<64x512xf32>
    %3 = vector.broadcast %1 : vector<1x512xf32> to vector<64x512xf32>
    %4 = arith.mulf %2, %3 : vector<64x512xf32>
    %c0_3 = arith.constant 0 : index
    %c0_4 = arith.constant 0 : index
    %5 = vector.load %arg2[%c0_3, %c0_4] : memref<1x512xf32, #tpu.memory_space<vmem>>, vector<1x512xf32>
    %6 = vector.broadcast %5 : vector<1x512xf32> to vector<64x512xf32>
    %7 = arith.addf %4, %6 : vector<64x512xf32>
    %c0_5 = arith.constant 0 : index
    %c0_6 = arith.constant 0 : index
    %8 = vector.load %arg7[%c0_5, %c0_6] : memref<64x512xf32, #tpu.memory_space<vmem>>, vector<64x512xf32>
    tpu.vector_store %arg7[%c0_5, %c0_6], %7 {strides = array<i32>} : memref<64x512xf32, #tpu.memory_space<vmem>>, vector<64x512xf32>,
    %c0_7 = arith.constant 0 : index
    %c0_8 = arith.constant 0 : index
    %9 = vector.load %arg3[%c0_7, %c0_8] : memref<128x512xbf16, #tpu.memory_space<vmem>>, vector<128x512xbf16>
    %c0_9 = arith.constant 0 : index
    %c0_10 = arith.constant 0 : index
    %10 = vector.load %arg4[%c0_9, %c0_10] : memref<128x128xf32, #tpu.memory_space<vmem>>, vector<128x128xf32>
    %c0_11 = arith.constant 0 : index
    %c0_12 = arith.constant 0 : index
    %11 = vector.load %arg5[%c0_11, %c0_12] : memref<1x128xf32, #tpu.memory_space<vmem>>, vector<1x128xf32>
    %cst = arith.constant 0.000000e+00 : f32
    %12 = vector.broadcast %cst : f32 to vector<8x128xf32>
    %c0_13 = arith.constant 0 : index
    %c0_14 = arith.constant 0 : index
    %13 = vector.load %arg7[%c0_13, %c0_14] : memref<64x512xf32, #tpu.memory_space<vmem>>, vector<8x512xf32>
    %14 = vector.extract_strided_slice %13 {offsets = [0, 0], sizes = [8, 128], strides = [1, 1]} : vector<8x512xf32> to vector<8x128xf32>
    %15 = arith.negf %14 : vector<8x128xf32>
    %16 = math.exp %15 : vector<8x128xf32>
    %cst_15 = arith.constant 1.000000e+00 : f32
    %17 = vector.broadcast %cst_15 : f32 to vector<8x128xf32>
    %18 = arith.addf %17, %16 : vector<8x128xf32>
    %19 = arith.divf %17, %18 : vector<8x128xf32>
    %20 = vector.extract_strided_slice %13 {offsets = [0, 128], sizes = [8, 128], strides = [1, 1]} : vector<8x512xf32> to vector<8x128xf32>
    %21 = arith.negf %20 : vector<8x128xf32>
    %22 = math.exp %21 : vector<8x128xf32>
    %cst_16 = arith.constant 1.000000e+00 : f32
    %23 = vector.broadcast %cst_16 : f32 to vector<8x128xf32>
    %24 = arith.addf %23, %22 : vector<8x128xf32>
    %25 = arith.divf %23, %24 : vector<8x128xf32>
    %26 = vector.extract_strided_slice %13 {offsets = [0, 256], sizes = [8, 128], strides = [1, 1]} : vector<8x512xf32> to vector<8x128xf32>
    %27 = math.tanh %26 : vector<8x128xf32>
    %28 = vector.extract_strided_slice %13 {offsets = [0, 384], sizes = [8, 128], strides = [1, 1]} : vector<8x512xf32> to vector<8x128xf32>
    %29 = arith.negf %28 : vector<8x128xf32>
    %30 = math.exp %29 : vector<8x128xf32>
    %cst_17 = arith.constant 1.000000e+00 : f32
    %31 = vector.broadcast %cst_17 : f32 to vector<8x128xf32>
    %32 = arith.addf %31, %30 : vector<8x128xf32>
    %33 = arith.divf %31, %32 : vector<8x128xf32>
    %34 = arith.mulf %25, %12 : vector<8x128xf32>
    %35 = arith.mulf %19, %27 : vector<8x128xf32>
    %36 = arith.addf %34, %35 : vector<8x128xf32>
    %37 = math.tanh %36 : vector<8x128xf32>
    %38 = arith.mulf %33, %37 : vector<8x128xf32>
    %cst_18 = arith.constant dense<0.000000e+00> : vector<8x128xf32>
    %39 = tpu.matmul %38, %10, %cst_18 {dimension_numbers = #tpu.dot_dimension_numbers<[1], [0], [0], [1], [0, 0, 1, 1], [], []>} : vector<8x128xf32>, vector<128x128xf32>, vector<8x128xf32> -> vector<8x128xf32>
    %40 = vector.broadcast %11 : vector<1x128xf32> to vector<8x128xf32>
    %41 = arith.addf %39, %40 : vector<8x128xf32>
    %42 = arith.negf %41 : vector<8x128xf32>
    %43 = math.exp %42 : vector<8x128xf32>
    %cst_19 = arith.constant 1.000000e+00 : f32
    %44 = vector.broadcast %cst_19 : f32 to vector<8x128xf32>
    %45 = arith.addf %44, %43 : vector<8x128xf32>
    %46 = arith.divf %44, %45 : vector<8x128xf32>
    %c0_20 = arith.constant 0 : index
    %c0_21 = arith.constant 0 : index
    %47 = vector.load %arg6[%c0_20, %c0_21] : memref<64x128xf32, #tpu.memory_space<vmem>>, vector<8x128xf32>
    tpu.vector_store %arg6[%c0_20, %c0_21], %46 {strides = array<i32>} : memref<64x128xf32, #tpu.memory_space<vmem>>, vector<8x128xf32>,
    %48 = arith.truncf %38 : vector<8x128xf32> to vector<8x128xbf16>
    %c8 = arith.constant 8 : index
    %c0_22 = arith.constant 0 : index
    %49 = vector.load %arg7[%c8, %c0_22] : memref<64x512xf32, #tpu.memory_space<vmem>>, vector<8x512xf32>
    %cst_23 = arith.constant dense<0.000000e+00> : vector<8x512xf32>
    %50 = tpu.matmul %48, %9, %cst_23 {dimension_numbers = #tpu.dot_dimension_numbers<[1], [0], [0], [1], [0, 0, 1, 1], [], []>} : vector<8x128xbf16>, vector<128x512xbf16>, vector<8x512xf32> -> vector<8x512xf32>
    %51 = arith.addf %49, %50 : vector<8x512xf32>
    %52 = vector.extract_strided_slice %51 {offsets = [0, 0], sizes = [8, 128], strides = [1, 1]} : vector<8x512xf32> to vector<8x128xf32>
    %53 = arith.negf %52 : vector<8x128xf32>
    %54 = math.exp %53 : vector<8x128xf32>
    %cst_24 = arith.constant 1.000000e+00 : f32
    %55 = vector.broadcast %cst_24 : f32 to vector<8x128xf32>
    %56 = arith.addf %55, %54 : vector<8x128xf32>
    %57 = arith.divf %55, %56 : vector<8x128xf32>
    %58 = vector.extract_strided_slice %51 {offsets = [0, 128], sizes = [8, 128], strides = [1, 1]} : vector<8x512xf32> to vector<8x128xf32>
    %59 = arith.negf %58 : vector<8x128xf32>
    %60 = math.exp %59 : vector<8x128xf32>
    %cst_25 = arith.constant 1.000000e+00 : f32
    %61 = vector.broadcast %cst_25 : f32 to vector<8x128xf32>
    %62 = arith.addf %61, %60 : vector<8x128xf32>
    %63 = arith.divf %61, %62 : vector<8x128xf32>
    %64 = vector.extract_strided_slice %51 {offsets = [0, 256], sizes = [8, 128], strides = [1, 1]} : vector<8x512xf32> to vector<8x128xf32>
    %65 = math.tanh %64 : vector<8x128xf32>
    %66 = vector.extract_strided_slice %51 {offsets = [0, 384], sizes = [8, 128], strides = [1, 1]} : vector<8x512xf32> to vector<8x128xf32>
    %67 = arith.negf %66 : vector<8x128xf32>
    %68 = math.exp %67 : vector<8x128xf32>
    %cst_26 = arith.constant 1.000000e+00 : f32
    %69 = vector.broadcast %cst_26 : f32 to vector<8x128xf32>
    %70 = arith.addf %69, %68 : vector<8x128xf32>
    %71 = arith.divf %69, %70 : vector<8x128xf32>
    %72 = arith.mulf %63, %36 : vector<8x128xf32>
    %73 = arith.mulf %57, %65 : vector<8x128xf32>
    %74 = arith.addf %72, %73 : vector<8x128xf32>
    %75 = math.tanh %74 : vector<8x128xf32>
    %76 = arith.mulf %71, %75 : vector<8x128xf32>
    %cst_27 = arith.constant dense<0.000000e+00> : vector<8x128xf32>
    %77 = tpu.matmul %76, %10, %cst_27 {dimension_numbers = #tpu.dot_dimension_numbers<[1], [0], [0], [1], [0, 0, 1, 1], [], []>} : vector<8x128xf32>, vector<128x128xf32>, vector<8x128xf32> -> vector<8x128xf32>
    %78 = vector.broadcast %11 : vector<1x128xf32> to vector<8x128xf32>
    %79 = arith.addf %77, %78 : vector<8x128xf32>
    %80 = arith.negf %79 : vector<8x128xf32>
    %81 = math.exp %80 : vector<8x128xf32>
    %cst_28 = arith.constant 1.000000e+00 : f32
    %82 = vector.broadcast %cst_28 : f32 to vector<8x128xf32>
    %83 = arith.addf %82, %81 : vector<8x128xf32>
    %84 = arith.divf %82, %83 : vector<8x128xf32>
    %c8_29 = arith.constant 8 : index
    %c0_30 = arith.constant 0 : index
    %85 = vector.load %arg6[%c8_29, %c0_30] : memref<64x128xf32, #tpu.memory_space<vmem>>, vector<8x128xf32>
    tpu.vector_store %arg6[%c8_29, %c0_30], %84 {strides = array<i32>} : memref<64x128xf32, #tpu.memory_space<vmem>>, vector<8x128xf32>,
    %86 = arith.truncf %76 : vector<8x128xf32> to vector<8x128xbf16>
    %c16 = arith.constant 16 : index
    %c0_31 = arith.constant 0 : index
    %87 = vector.load %arg7[%c16, %c0_31] : memref<64x512xf32, #tpu.memory_space<vmem>>, vector<8x512xf32>
    %cst_32 = arith.constant dense<0.000000e+00> : vector<8x512xf32>
    %88 = tpu.matmul %86, %9, %cst_32 {dimension_numbers = #tpu.dot_dimension_numbers<[1], [0], [0], [1], [0, 0, 1, 1], [], []>} : vector<8x128xbf16>, vector<128x512xbf16>, vector<8x512xf32> -> vector<8x512xf32>
    %89 = arith.addf %87, %88 : vector<8x512xf32>
    %90 = vector.extract_strided_slice %89 {offsets = [0, 0], sizes = [8, 128], strides = [1, 1]} : vector<8x512xf32> to vector<8x128xf32>
    %91 = arith.negf %90 : vector<8x128xf32>
    %92 = math.exp %91 : vector<8x128xf32>
    %cst_33 = arith.constant 1.000000e+00 : f32
    %93 = vector.broadcast %cst_33 : f32 to vector<8x128xf32>
    %94 = arith.addf %93, %92 : vector<8x128xf32>
    %95 = arith.divf %93, %94 : vector<8x128xf32>
    %96 = vector.extract_strided_slice %89 {offsets = [0, 128], sizes = [8, 128], strides = [1, 1]} : vector<8x512xf32> to vector<8x128xf32>
    %97 = arith.negf %96 : vector<8x128xf32>
    %98 = math.exp %97 : vector<8x128xf32>
    %cst_34 = arith.constant 1.000000e+00 : f32
    %99 = vector.broadcast %cst_34 : f32 to vector<8x128xf32>
    %100 = arith.addf %99, %98 : vector<8x128xf32>
    %101 = arith.divf %99, %100 : vector<8x128xf32>
    %102 = vector.extract_strided_slice %89 {offsets = [0, 256], sizes = [8, 128], strides = [1, 1]} : vector<8x512xf32> to vector<8x128xf32>
    %103 = math.tanh %102 : vector<8x128xf32>
    %104 = vector.extract_strided_slice %89 {offsets = [0, 384], sizes = [8, 128], strides = [1, 1]} : vector<8x512xf32> to vector<8x128xf32>
    %105 = arith.negf %104 : vector<8x128xf32>
    %106 = math.exp %105 : vector<8x128xf32>
    %cst_35 = arith.constant 1.000000e+00 : f32
    %107 = vector.broadcast %cst_35 : f32 to vector<8x128xf32>
    %108 = arith.addf %107, %106 : vector<8x128xf32>
    %109 = arith.divf %107, %108 : vector<8x128xf32>
    %110 = arith.mulf %101, %74 : vector<8x128xf32>
    %111 = arith.mulf %95, %103 : vector<8x128xf32>
    %112 = arith.addf %110, %111 : vector<8x128xf32>
    %113 = math.tanh %112 : vector<8x128xf32>
    %114 = arith.mulf %109, %113 : vector<8x128xf32>
    %cst_36 = arith.constant dense<0.000000e+00> : vector<8x128xf32>
    %115 = tpu.matmul %114, %10, %cst_36 {dimension_numbers = #tpu.dot_dimension_numbers<[1], [0], [0], [1], [0, 0, 1, 1], [], []>} : vector<8x128xf32>, vector<128x128xf32>, vector<8x128xf32> -> vector<8x128xf32>
    %116 = vector.broadcast %11 : vector<1x128xf32> to vector<8x128xf32>
    %117 = arith.addf %115, %116 : vector<8x128xf32>
    %118 = arith.negf %117 : vector<8x128xf32>
    %119 = math.exp %118 : vector<8x128xf32>
    %cst_37 = arith.constant 1.000000e+00 : f32
    %120 = vector.broadcast %cst_37 : f32 to vector<8x128xf32>
    %121 = arith.addf %120, %119 : vector<8x128xf32>
    %122 = arith.divf %120, %121 : vector<8x128xf32>
    %c16_38 = arith.constant 16 : index
    %c0_39 = arith.constant 0 : index
    %123 = vector.load %arg6[%c16_38, %c0_39] : memref<64x128xf32, #tpu.memory_space<vmem>>, vector<8x128xf32>
    tpu.vector_store %arg6[%c16_38, %c0_39], %122 {strides = array<i32>} : memref<64x128xf32, #tpu.memory_space<vmem>>, vector<8x128xf32>,
    %124 = arith.truncf %114 : vector<8x128xf32> to vector<8x128xbf16>
    %c24 = arith.constant 24 : index
    %c0_40 = arith.constant 0 : index
    %125 = vector.load %arg7[%c24, %c0_40] : memref<64x512xf32, #tpu.memory_space<vmem>>, vector<8x512xf32>
    %cst_41 = arith.constant dense<0.000000e+00> : vector<8x512xf32>
    %126 = tpu.matmul %124, %9, %cst_41 {dimension_numbers = #tpu.dot_dimension_numbers<[1], [0], [0], [1], [0, 0, 1, 1], [], []>} : vector<8x128xbf16>, vector<128x512xbf16>, vector<8x512xf32> -> vector<8x512xf32>
    %127 = arith.addf %125, %126 : vector<8x512xf32>
    %128 = vector.extract_strided_slice %127 {offsets = [0, 0], sizes = [8, 128], strides = [1, 1]} : vector<8x512xf32> to vector<8x128xf32>
    %129 = arith.negf %128 : vector<8x128xf32>
    %130 = math.exp %129 : vector<8x128xf32>
    %cst_42 = arith.constant 1.000000e+00 : f32
    %131 = vector.broadcast %cst_42 : f32 to vector<8x128xf32>
    %132 = arith.addf %131, %130 : vector<8x128xf32>
    %133 = arith.divf %131, %132 : vector<8x128xf32>
    %134 = vector.extract_strided_slice %127 {offsets = [0, 128], sizes = [8, 128], strides = [1, 1]} : vector<8x512xf32> to vector<8x128xf32>
    %135 = arith.negf %134 : vector<8x128xf32>
    %136 = math.exp %135 : vector<8x128xf32>
    %cst_43 = arith.constant 1.000000e+00 : f32
    %137 = vector.broadcast %cst_43 : f32 to vector<8x128xf32>
    %138 = arith.addf %137, %136 : vector<8x128xf32>
    %139 = arith.divf %137, %138 : vector<8x128xf32>
    %140 = vector.extract_strided_slice %127 {offsets = [0, 256], sizes = [8, 128], strides = [1, 1]} : vector<8x512xf32> to vector<8x128xf32>
    %141 = math.tanh %140 : vector<8x128xf32>
    %142 = vector.extract_strided_slice %127 {offsets = [0, 384], sizes = [8, 128], strides = [1, 1]} : vector<8x512xf32> to vector<8x128xf32>
    %143 = arith.negf %142 : vector<8x128xf32>
    %144 = math.exp %143 : vector<8x128xf32>
    %cst_44 = arith.constant 1.000000e+00 : f32
    %145 = vector.broadcast %cst_44 : f32 to vector<8x128xf32>
    %146 = arith.addf %145, %144 : vector<8x128xf32>
    %147 = arith.divf %145, %146 : vector<8x128xf32>
    %148 = arith.mulf %139, %112 : vector<8x128xf32>
    %149 = arith.mulf %133, %141 : vector<8x128xf32>
    %150 = arith.addf %148, %149 : vector<8x128xf32>
    %151 = math.tanh %150 : vector<8x128xf32>
    %152 = arith.mulf %147, %151 : vector<8x128xf32>
    %cst_45 = arith.constant dense<0.000000e+00> : vector<8x128xf32>
    %153 = tpu.matmul %152, %10, %cst_45 {dimension_numbers = #tpu.dot_dimension_numbers<[1], [0], [0], [1], [0, 0, 1, 1], [], []>} : vector<8x128xf32>, vector<128x128xf32>, vector<8x128xf32> -> vector<8x128xf32>
    %154 = vector.broadcast %11 : vector<1x128xf32> to vector<8x128xf32>
    %155 = arith.addf %153, %154 : vector<8x128xf32>
    %156 = arith.negf %155 : vector<8x128xf32>
    %157 = math.exp %156 : vector<8x128xf32>
    %cst_46 = arith.constant 1.000000e+00 : f32
    %158 = vector.broadcast %cst_46 : f32 to vector<8x128xf32>
    %159 = arith.addf %158, %157 : vector<8x128xf32>
    %160 = arith.divf %158, %159 : vector<8x128xf32>
    %c24_47 = arith.constant 24 : index
    %c0_48 = arith.constant 0 : index
    %161 = vector.load %arg6[%c24_47, %c0_48] : memref<64x128xf32, #tpu.memory_space<vmem>>, vector<8x128xf32>
    tpu.vector_store %arg6[%c24_47, %c0_48], %160 {strides = array<i32>} : memref<64x128xf32, #tpu.memory_space<vmem>>, vector<8x128xf32>,
    %162 = arith.truncf %152 : vector<8x128xf32> to vector<8x128xbf16>
    %c32 = arith.constant 32 : index
    %c0_49 = arith.constant 0 : index
    %163 = vector.load %arg7[%c32, %c0_49] : memref<64x512xf32, #tpu.memory_space<vmem>>, vector<8x512xf32>
    %cst_50 = arith.constant dense<0.000000e+00> : vector<8x512xf32>
    %164 = tpu.matmul %162, %9, %cst_50 {dimension_numbers = #tpu.dot_dimension_numbers<[1], [0], [0], [1], [0, 0, 1, 1], [], []>} : vector<8x128xbf16>, vector<128x512xbf16>, vector<8x512xf32> -> vector<8x512xf32>
    %165 = arith.addf %163, %164 : vector<8x512xf32>
    %166 = vector.extract_strided_slice %165 {offsets = [0, 0], sizes = [8, 128], strides = [1, 1]} : vector<8x512xf32> to vector<8x128xf32>
    %167 = arith.negf %166 : vector<8x128xf32>
    %168 = math.exp %167 : vector<8x128xf32>
    %cst_51 = arith.constant 1.000000e+00 : f32
    %169 = vector.broadcast %cst_51 : f32 to vector<8x128xf32>
    %170 = arith.addf %169, %168 : vector<8x128xf32>
    %171 = arith.divf %169, %170 : vector<8x128xf32>
    %172 = vector.extract_strided_slice %165 {offsets = [0, 128], sizes = [8, 128], strides = [1, 1]} : vector<8x512xf32> to vector<8x128xf32>
    %173 = arith.negf %172 : vector<8x128xf32>
    %174 = math.exp %173 : vector<8x128xf32>
    %cst_52 = arith.constant 1.000000e+00 : f32
    %175 = vector.broadcast %cst_52 : f32 to vector<8x128xf32>
    %176 = arith.addf %175, %174 : vector<8x128xf32>
    %177 = arith.divf %175, %176 : vector<8x128xf32>
    %178 = vector.extract_strided_slice %165 {offsets = [0, 256], sizes = [8, 128], strides = [1, 1]} : vector<8x512xf32> to vector<8x128xf32>
    %179 = math.tanh %178 : vector<8x128xf32>
    %180 = vector.extract_strided_slice %165 {offsets = [0, 384], sizes = [8, 128], strides = [1, 1]} : vector<8x512xf32> to vector<8x128xf32>
    %181 = arith.negf %180 : vector<8x128xf32>
    %182 = math.exp %181 : vector<8x128xf32>
    %cst_53 = arith.constant 1.000000e+00 : f32
    %183 = vector.broadcast %cst_53 : f32 to vector<8x128xf32>
    %184 = arith.addf %183, %182 : vector<8x128xf32>
    %185 = arith.divf %183, %184 : vector<8x128xf32>
    %186 = arith.mulf %177, %150 : vector<8x128xf32>
    %187 = arith.mulf %171, %179 : vector<8x128xf32>
    %188 = arith.addf %186, %187 : vector<8x128xf32>
    %189 = math.tanh %188 : vector<8x128xf32>
    %190 = arith.mulf %185, %189 : vector<8x128xf32>
    %cst_54 = arith.constant dense<0.000000e+00> : vector<8x128xf32>
    %191 = tpu.matmul %190, %10, %cst_54 {dimension_numbers = #tpu.dot_dimension_numbers<[1], [0], [0], [1], [0, 0, 1, 1], [], []>} : vector<8x128xf32>, vector<128x128xf32>, vector<8x128xf32> -> vector<8x128xf32>
    %192 = vector.broadcast %11 : vector<1x128xf32> to vector<8x128xf32>
    %193 = arith.addf %191, %192 : vector<8x128xf32>
    %194 = arith.negf %193 : vector<8x128xf32>
    %195 = math.exp %194 : vector<8x128xf32>
    %cst_55 = arith.constant 1.000000e+00 : f32
    %196 = vector.broadcast %cst_55 : f32 to vector<8x128xf32>
    %197 = arith.addf %196, %195 : vector<8x128xf32>
    %198 = arith.divf %196, %197 : vector<8x128xf32>
    %c32_56 = arith.constant 32 : index
    %c0_57 = arith.constant 0 : index
    %199 = vector.load %arg6[%c32_56, %c0_57] : memref<64x128xf32, #tpu.memory_space<vmem>>, vector<8x128xf32>
    tpu.vector_store %arg6[%c32_56, %c0_57], %198 {strides = array<i32>} : memref<64x128xf32, #tpu.memory_space<vmem>>, vector<8x128xf32>,
    %200 = arith.truncf %190 : vector<8x128xf32> to vector<8x128xbf16>
    %c40 = arith.constant 40 : index
    %c0_58 = arith.constant 0 : index
    %201 = vector.load %arg7[%c40, %c0_58] : memref<64x512xf32, #tpu.memory_space<vmem>>, vector<8x512xf32>
    %cst_59 = arith.constant dense<0.000000e+00> : vector<8x512xf32>
    %202 = tpu.matmul %200, %9, %cst_59 {dimension_numbers = #tpu.dot_dimension_numbers<[1], [0], [0], [1], [0, 0, 1, 1], [], []>} : vector<8x128xbf16>, vector<128x512xbf16>, vector<8x512xf32> -> vector<8x512xf32>
    %203 = arith.addf %201, %202 : vector<8x512xf32>
    %204 = vector.extract_strided_slice %203 {offsets = [0, 0], sizes = [8, 128], strides = [1, 1]} : vector<8x512xf32> to vector<8x128xf32>
    %205 = arith.negf %204 : vector<8x128xf32>
    %206 = math.exp %205 : vector<8x128xf32>
    %cst_60 = arith.constant 1.000000e+00 : f32
    %207 = vector.broadcast %cst_60 : f32 to vector<8x128xf32>
    %208 = arith.addf %207, %206 : vector<8x128xf32>
    %209 = arith.divf %207, %208 : vector<8x128xf32>
    %210 = vector.extract_strided_slice %203 {offsets = [0, 128], sizes = [8, 128], strides = [1, 1]} : vector<8x512xf32> to vector<8x128xf32>
    %211 = arith.negf %210 : vector<8x128xf32>
    %212 = math.exp %211 : vector<8x128xf32>
    %cst_61 = arith.constant 1.000000e+00 : f32
    %213 = vector.broadcast %cst_61 : f32 to vector<8x128xf32>
    %214 = arith.addf %213, %212 : vector<8x128xf32>
    %215 = arith.divf %213, %214 : vector<8x128xf32>
    %216 = vector.extract_strided_slice %203 {offsets = [0, 256], sizes = [8, 128], strides = [1, 1]} : vector<8x512xf32> to vector<8x128xf32>
    %217 = math.tanh %216 : vector<8x128xf32>
    %218 = vector.extract_strided_slice %203 {offsets = [0, 384], sizes = [8, 128], strides = [1, 1]} : vector<8x512xf32> to vector<8x128xf32>
    %219 = arith.negf %218 : vector<8x128xf32>
    %220 = math.exp %219 : vector<8x128xf32>
    %cst_62 = arith.constant 1.000000e+00 : f32
    %221 = vector.broadcast %cst_62 : f32 to vector<8x128xf32>
    %222 = arith.addf %221, %220 : vector<8x128xf32>
    %223 = arith.divf %221, %222 : vector<8x128xf32>
    %224 = arith.mulf %215, %188 : vector<8x128xf32>
    %225 = arith.mulf %209, %217 : vector<8x128xf32>
    %226 = arith.addf %224, %225 : vector<8x128xf32>
    %227 = math.tanh %226 : vector<8x128xf32>
    %228 = arith.mulf %223, %227 : vector<8x128xf32>
    %cst_63 = arith.constant dense<0.000000e+00> : vector<8x128xf32>
    %229 = tpu.matmul %228, %10, %cst_63 {dimension_numbers = #tpu.dot_dimension_numbers<[1], [0], [0], [1], [0, 0, 1, 1], [], []>} : vector<8x128xf32>, vector<128x128xf32>, vector<8x128xf32> -> vector<8x128xf32>
    %230 = vector.broadcast %11 : vector<1x128xf32> to vector<8x128xf32>
    %231 = arith.addf %229, %230 : vector<8x128xf32>
    %232 = arith.negf %231 : vector<8x128xf32>
    %233 = math.exp %232 : vector<8x128xf32>
    %cst_64 = arith.constant 1.000000e+00 : f32
    %234 = vector.broadcast %cst_64 : f32 to vector<8x128xf32>
    %235 = arith.addf %234, %233 : vector<8x128xf32>
    %236 = arith.divf %234, %235 : vector<8x128xf32>
    %c40_65 = arith.constant 40 : index
    %c0_66 = arith.constant 0 : index
    %237 = vector.load %arg6[%c40_65, %c0_66] : memref<64x128xf32, #tpu.memory_space<vmem>>, vector<8x128xf32>
    tpu.vector_store %arg6[%c40_65, %c0_66], %236 {strides = array<i32>} : memref<64x128xf32, #tpu.memory_space<vmem>>, vector<8x128xf32>,
    %238 = arith.truncf %228 : vector<8x128xf32> to vector<8x128xbf16>
    %c48 = arith.constant 48 : index
    %c0_67 = arith.constant 0 : index
    %239 = vector.load %arg7[%c48, %c0_67] : memref<64x512xf32, #tpu.memory_space<vmem>>, vector<8x512xf32>
    %cst_68 = arith.constant dense<0.000000e+00> : vector<8x512xf32>
    %240 = tpu.matmul %238, %9, %cst_68 {dimension_numbers = #tpu.dot_dimension_numbers<[1], [0], [0], [1], [0, 0, 1, 1], [], []>} : vector<8x128xbf16>, vector<128x512xbf16>, vector<8x512xf32> -> vector<8x512xf32>
    %241 = arith.addf %239, %240 : vector<8x512xf32>
    %242 = vector.extract_strided_slice %241 {offsets = [0, 0], sizes = [8, 128], strides = [1, 1]} : vector<8x512xf32> to vector<8x128xf32>
    %243 = arith.negf %242 : vector<8x128xf32>
    %244 = math.exp %243 : vector<8x128xf32>
    %cst_69 = arith.constant 1.000000e+00 : f32
    %245 = vector.broadcast %cst_69 : f32 to vector<8x128xf32>
    %246 = arith.addf %245, %244 : vector<8x128xf32>
    %247 = arith.divf %245, %246 : vector<8x128xf32>
    %248 = vector.extract_strided_slice %241 {offsets = [0, 128], sizes = [8, 128], strides = [1, 1]} : vector<8x512xf32> to vector<8x128xf32>
    %249 = arith.negf %248 : vector<8x128xf32>
    %250 = math.exp %249 : vector<8x128xf32>
    %cst_70 = arith.constant 1.000000e+00 : f32
    %251 = vector.broadcast %cst_70 : f32 to vector<8x128xf32>
    %252 = arith.addf %251, %250 : vector<8x128xf32>
    %253 = arith.divf %251, %252 : vector<8x128xf32>
    %254 = vector.extract_strided_slice %241 {offsets = [0, 256], sizes = [8, 128], strides = [1, 1]} : vector<8x512xf32> to vector<8x128xf32>
    %255 = math.tanh %254 : vector<8x128xf32>
    %256 = vector.extract_strided_slice %241 {offsets = [0, 384], sizes = [8, 128], strides = [1, 1]} : vector<8x512xf32> to vector<8x128xf32>
    %257 = arith.negf %256 : vector<8x128xf32>
    %258 = math.exp %257 : vector<8x128xf32>
    %cst_71 = arith.constant 1.000000e+00 : f32
    %259 = vector.broadcast %cst_71 : f32 to vector<8x128xf32>
    %260 = arith.addf %259, %258 : vector<8x128xf32>
    %261 = arith.divf %259, %260 : vector<8x128xf32>
    %262 = arith.mulf %253, %226 : vector<8x128xf32>
    %263 = arith.mulf %247, %255 : vector<8x128xf32>
    %264 = arith.addf %262, %263 : vector<8x128xf32>
    %265 = math.tanh %264 : vector<8x128xf32>
    %266 = arith.mulf %261, %265 : vector<8x128xf32>
    %cst_72 = arith.constant dense<0.000000e+00> : vector<8x128xf32>
    %267 = tpu.matmul %266, %10, %cst_72 {dimension_numbers = #tpu.dot_dimension_numbers<[1], [0], [0], [1], [0, 0, 1, 1], [], []>} : vector<8x128xf32>, vector<128x128xf32>, vector<8x128xf32> -> vector<8x128xf32>
    %268 = vector.broadcast %11 : vector<1x128xf32> to vector<8x128xf32>
    %269 = arith.addf %267, %268 : vector<8x128xf32>
    %270 = arith.negf %269 : vector<8x128xf32>
    %271 = math.exp %270 : vector<8x128xf32>
    %cst_73 = arith.constant 1.000000e+00 : f32
    %272 = vector.broadcast %cst_73 : f32 to vector<8x128xf32>
    %273 = arith.addf %272, %271 : vector<8x128xf32>
    %274 = arith.divf %272, %273 : vector<8x128xf32>
    %c48_74 = arith.constant 48 : index
    %c0_75 = arith.constant 0 : index
    %275 = vector.load %arg6[%c48_74, %c0_75] : memref<64x128xf32, #tpu.memory_space<vmem>>, vector<8x128xf32>
    tpu.vector_store %arg6[%c48_74, %c0_75], %274 {strides = array<i32>} : memref<64x128xf32, #tpu.memory_space<vmem>>, vector<8x128xf32>,
    %276 = arith.truncf %266 : vector<8x128xf32> to vector<8x128xbf16>
    %c56 = arith.constant 56 : index
    %c0_76 = arith.constant 0 : index
    %277 = vector.load %arg7[%c56, %c0_76] : memref<64x512xf32, #tpu.memory_space<vmem>>, vector<8x512xf32>
    %cst_77 = arith.constant dense<0.000000e+00> : vector<8x512xf32>
    %278 = tpu.matmul %276, %9, %cst_77 {dimension_numbers = #tpu.dot_dimension_numbers<[1], [0], [0], [1], [0, 0, 1, 1], [], []>} : vector<8x128xbf16>, vector<128x512xbf16>, vector<8x512xf32> -> vector<8x512xf32>
    %279 = arith.addf %277, %278 : vector<8x512xf32>
    %280 = vector.extract_strided_slice %279 {offsets = [0, 0], sizes = [8, 128], strides = [1, 1]} : vector<8x512xf32> to vector<8x128xf32>
    %281 = arith.negf %280 : vector<8x128xf32>
    %282 = math.exp %281 : vector<8x128xf32>
    %cst_78 = arith.constant 1.000000e+00 : f32
    %283 = vector.broadcast %cst_78 : f32 to vector<8x128xf32>
    %284 = arith.addf %283, %282 : vector<8x128xf32>
    %285 = arith.divf %283, %284 : vector<8x128xf32>
    %286 = vector.extract_strided_slice %279 {offsets = [0, 128], sizes = [8, 128], strides = [1, 1]} : vector<8x512xf32> to vector<8x128xf32>
    %287 = arith.negf %286 : vector<8x128xf32>
    %288 = math.exp %287 : vector<8x128xf32>
    %cst_79 = arith.constant 1.000000e+00 : f32
    %289 = vector.broadcast %cst_79 : f32 to vector<8x128xf32>
    %290 = arith.addf %289, %288 : vector<8x128xf32>
    %291 = arith.divf %289, %290 : vector<8x128xf32>
    %292 = vector.extract_strided_slice %279 {offsets = [0, 256], sizes = [8, 128], strides = [1, 1]} : vector<8x512xf32> to vector<8x128xf32>
    %293 = math.tanh %292 : vector<8x128xf32>
    %294 = vector.extract_strided_slice %279 {offsets = [0, 384], sizes = [8, 128], strides = [1, 1]} : vector<8x512xf32> to vector<8x128xf32>
    %295 = arith.negf %294 : vector<8x128xf32>
    %296 = math.exp %295 : vector<8x128xf32>
    %cst_80 = arith.constant 1.000000e+00 : f32
    %297 = vector.broadcast %cst_80 : f32 to vector<8x128xf32>
    %298 = arith.addf %297, %296 : vector<8x128xf32>
    %299 = arith.divf %297, %298 : vector<8x128xf32>
    %300 = arith.mulf %291, %264 : vector<8x128xf32>
    %301 = arith.mulf %285, %293 : vector<8x128xf32>
    %302 = arith.addf %300, %301 : vector<8x128xf32>
    %303 = math.tanh %302 : vector<8x128xf32>
    %304 = arith.mulf %299, %303 : vector<8x128xf32>
    %cst_81 = arith.constant dense<0.000000e+00> : vector<8x128xf32>
    %305 = tpu.matmul %304, %10, %cst_81 {dimension_numbers = #tpu.dot_dimension_numbers<[1], [0], [0], [1], [0, 0, 1, 1], [], []>} : vector<8x128xf32>, vector<128x128xf32>, vector<8x128xf32> -> vector<8x128xf32>
    %306 = vector.broadcast %11 : vector<1x128xf32> to vector<8x128xf32>
    %307 = arith.addf %305, %306 : vector<8x128xf32>
    %308 = arith.negf %307 : vector<8x128xf32>
    %309 = math.exp %308 : vector<8x128xf32>
    %cst_82 = arith.constant 1.000000e+00 : f32
    %310 = vector.broadcast %cst_82 : f32 to vector<8x128xf32>
    %311 = arith.addf %310, %309 : vector<8x128xf32>
    %312 = arith.divf %310, %311 : vector<8x128xf32>
    %c56_83 = arith.constant 56 : index
    %c0_84 = arith.constant 0 : index
    %313 = vector.load %arg6[%c56_83, %c0_84] : memref<64x128xf32, #tpu.memory_space<vmem>>, vector<8x128xf32>
    tpu.vector_store %arg6[%c56_83, %c0_84], %312 {strides = array<i32>} : memref<64x128xf32, #tpu.memory_space<vmem>>, vector<8x128xf32>,
    return
  }
}

</mosaic_0001>

<bundles_post_ra>
// kernel: forward.1
= control target key start
LH: loop header
LB: loop body
LE: loop exit
PB: predicated region body
PF: predicated region fallthrough
CT: control target
= control target key end

     0   :  { %v3798_v0 = vmov 0   ;;  %v3794_v8 = vmov 0.0|0.0   ;;  %vm2802_vm0 = vmmov 0   ;;  %v3796_v37 = vmov 0.0   ;;  %s3787_s0 = inlined_call_operand.vmem [shape: f32[64,1], index: 0, kind: input, shape index: {}]   ;;  %s3788_s4 = inlined_call_operand.vmem [shape: f32[128,128], index: 4, kind: input, shape index: {}]   ;;  %s3789_s3 = inlined_call_operand.vmem [shape: bf16[128,512], index: 3, kind: input, shape index: {}]   ;;  %s3790_s1 = inlined_call_operand.vmem [shape: f32[1,512], index: 1, kind: input, shape index: {}]   ;;  %s3791_s2 = inlined_call_operand.vmem [shape: f32[1,512], index: 2, kind: input, shape index: {}]   ;;  %s3792_s5 = inlined_call_operand.vmem [shape: f32[1,128], index: 5, kind: input, shape index: {}]   ;;  %s3793_s6 = inlined_call_operand.vmem [shape: f32[64,128], index: 6, kind: output, shape index: {}]  }
   0x1   :  { %2557 = vset.pattern.permute.xlu0 %v3798_v0  ;;  %v24_v1 = vld [vmem:[%s3787_s0] sm:$0xff]  ;;  %569 = vmatprep.mubr.bf16.mxu1 %v3798_v0  ;;  %v25_v2 = vld [vmem:[%s3787_s0 + $0x8] sm:$0xff]  ;;  %v30_v4 = vld [vmem:[%s3787_s0 + $0x30] sm:$0xff]  ;;  %v74_v48 = vlaneseq }
   0x2   :  { %35 = vperm.xlu0 %2557, %v24_v1   ;;  %2558 = vset.pattern.permute.xlu1 %v3798_v0  ;;  %v28_v3 = vld [vmem:[%s3787_s0 + $0x20] sm:$0xff]  ;;  %v245_v6 = vld [vmem:[%s3788_s4 + $0x8] sm:$0xff]  ;;  %v246_v11 = vld [vmem:[%s3788_s4 + $0x10] sm:$0xff] }
   0x3   :  { %v244_v5 = vld [vmem:[%s3788_s4] sm:$0xff]  ;;  %2361 = vmatprep.subr.bf16.mxu0 %v3794_v8  ;;  %v247_v12 = vld [vmem:[%s3788_s4 + $0x18] sm:$0xff]  ;;  %v249_v17 = vld [vmem:[%s3788_s4 + $0x28] sm:$0xff]  ;;  %2113 = vmatprep.mubr.msk.f32.mxu0 %vm2802_vm0, %v3796_v37  ;;  %v75_v49 = vshrl.u32 %v74_v48, 7 }
   0x4   :  { %v2860_v7 = vpack.c.bf16 %v245_v6, %v244_v5  ;;  %v2867_v9 = vld [vmem:[%s3789_s3 + $0x4] ss:$16 sps:$4 sm:$0xff]   ;;  %v2873_v10 = vld [vmem:[%s3789_s3] ss:$16 sps:$4 sm:$0xff]   ;;  %v2882_v13 = vpack.c.bf16 %v247_v12, %v246_v11  ;;  %v251_v22 = vld [vmem:[%s3788_s4 + $0x38] sm:$0xff] }
   0x5   :  { %537 = vmatprep.subr.bf16.mxu1 %v2867_v9  ;;  %v2889_v14 = vld [vmem:[%s3789_s3 + $0x24] ss:$16 sps:$4 sm:$0xff]   ;;  %v2895_v15 = vld [vmem:[%s3789_s3 + $0x20] ss:$16 sps:$4 sm:$0xff]   ;;  %v253_v27 = vld [vmem:[%s3788_s4 + $0x48] sm:$0xff]  ;;  %v76_v50 = vsub.s32 0, %v75_v49 }
   0x6   :  { %40 = vperm.xlu0 %2557, %v25_v2   ;;  %2363 = vmatpush3.bf16.msra.mxu0 %v2860_v7  ;;  %v248_v16 = vld [vmem:[%s3788_s4 + $0x20] sm:$0xff]  ;;  %v250_v21 = vld [vmem:[%s3788_s4 + $0x30] sm:$0xff]  ;;  %v255_v32 = vld [vmem:[%s3788_s4 + $0x58] sm:$0xff]  ;;  %v80_v51 = vsub.s32 1, %v75_v49  ;;  %v88_v56 = vsub.s32 3, %v75_v49  ;;  %v84_v63 = vsub.s32 2, %v75_v49 }
   0x7   :  { %2364 = vmatprep.subr.bf16.mxu0 %v3794_v8  ;;  %538 = vmatpush1.bf16.msra.mxu1 %v2873_v10  ;;  %v2904_v18 = vpack.c.bf16 %v249_v17, %v248_v16  ;;  %v2911_v19 = vld [vmem:[%s3789_s3 + $0x44] ss:$16 sps:$4 sm:$0xff]   ;;  %v2917_v20 = vld [vmem:[%s3789_s3 + $0x40] ss:$16 sps:$4 sm:$0xff]   ;;  %v2926_v23 = vpack.c.bf16 %v251_v22, %v250_v21  ;;  %v257_v36 = vld [vmem:[%s3788_s4 + $0x68] sm:$0xff] }
   0x8   :  { %539 = vmatprep.subr.bf16.mxu1 %v2889_v14  ;;  %v2933_v24 = vld [vmem:[%s3789_s3 + $0x64] ss:$16 sps:$4 sm:$0xff]   ;;  %v2939_v25 = vld [vmem:[%s3789_s3 + $0x60] ss:$16 sps:$4 sm:$0xff]   ;;  %v259_v42 = vld [vmem:[%s3788_s4 + $0x78] sm:$0xff] }
   0x9   :  { %v252_v26 = vld [vmem:[%s3788_s4 + $0x40] sm:$0xff]  ;;  %v254_v31 = vld [vmem:[%s3788_s4 + $0x50] sm:$0xff]  ;;  %v3026_v46 = vld [vmem:[%s3789_s3 + $0xc] ss:$16 sps:$4 sm:$0xff]  }
   0xa   :  { %55 = vperm.xlu0 %2557, %v28_v3   ;;  %2366 = vmatpush3.bf16.msra.mxu0 %v2882_v13  ;;  %v2948_v28 = vpack.c.bf16 %v253_v27, %v252_v26  ;;  %v2955_v29 = vld [vmem:[%s3789_s3 + $0x84] ss:$16 sps:$4 sm:$0xff]   ;;  %v2960_v30 = vld [vmem:[%s3789_s3 + $0x80] ss:$16 sps:$4 sm:$0xff]   ;;  %v2975_v34 = vpack.c.bf16 %v255_v32, %v254_v31 }
   0xb   :  { %2367 = vmatprep.subr.bf16.mxu0 %v3794_v8  ;;  %540 = vmatpush1.bf16.msra.mxu1 %v2895_v15  ;;  %3820 = vst [vmem:[#allocation3_spill] sm:$0xff] %v2960_v30  ;;  %v2972_v33 = vld [vmem:[%s3789_s3 + $0xa4] ss:$16 sps:$4 sm:$0xff]   ;;  %v2989_v38 = vld [vmem:[%s3789_s3 + $0xa0] ss:$16 sps:$4 sm:$0xff]  }
   0xc   :  { %541 = vmatprep.subr.bf16.mxu1 %v2911_v19  ;;  %3821 = vst [vmem:[#allocation4_spill] sm:$0xff] %v2972_v33  ;;  %v256_v35 = vld [vmem:[%s3788_s4 + $0x60] sm:$0xff]  ;;  %3822 = vst [vmem:[#allocation5_spill] sm:$0xff] %v2989_v38  ;;  %v258_v41 = vld [vmem:[%s3788_s4 + $0x70] sm:$0xff] }
   0xd   :  { %v2993_v39 = vpack.c.bf16 %v257_v36, %v256_v35  ;;  %v2998_v40 = vld [vmem:[%s3789_s3 + $0xc4] ss:$16 sps:$4 sm:$0xff]   ;;  %v3011_v43 = vld [vmem:[%s3789_s3 + $0xc0] ss:$16 sps:$4 sm:$0xff]   ;;  %v3015_v44 = vpack.c.bf16 %v259_v42, %v258_v41 }
   0xe   :  { %65 = vperm.xlu0 %2557, %v30_v4   ;;  %2369 = vmatpush3.bf16.msra.mxu0 %v2904_v18  ;;  %3823 = vst [vmem:[#allocation6_spill] sm:$0xff] %v2998_v40  ;;  %3824 = vst [vmem:[#allocation7_spill] sm:$0xff] %v3011_v43  ;;  %v3020_v45 = vld [vmem:[%s3789_s3 + $0xe4] ss:$16 sps:$4 sm:$0xff]   ;;  %v3032_v47 = vld [vmem:[%s3789_s3 + $0xe0] ss:$16 sps:$4 sm:$0xff]  }
   0xf   :  { %2370 = vmatprep.subr.bf16.mxu0 %v3794_v8  ;;  %542 = vmatpush1.bf16.msra.mxu1 %v2917_v20  ;;  %3825 = vst [vmem:[#allocation8_spill] sm:$0xff] %v3020_v45  ;;  %3826 = vst [vmem:[#allocation9_spill] sm:$0xff] %v3032_v47  ;;  %v32_v52 = vld [vmem:[%s3790_s1] sm:$0xf] }
  0x10   :  { %543 = vmatprep.subr.bf16.mxu1 %v2933_v24  ;;  %v126_v53 = vld [vmem:[%s3791_s2] sm:$0xf]  ;;  %v3045_v54 = vrot.slane %v32_v52, %v76_v50  ;;  %v3047_v55 = vrot.slane %v32_v52, %v80_v51  ;;  %v3055_v62 = vrot.slane %v32_v52, %v88_v56  ;;  %v3062_v11 = vrot.slane %v32_v52, %v84_v63 }
  0x11   :  { %v3049_v57 = vrot.slane %v126_v53, %v76_v50  ;;  %v3051_v58 = vrot.slane %v126_v53, %v80_v51  ;;  %v3059_v5 = vrot.slane %v126_v53, %v88_v56  ;;  %v3065_v16 = vrot.slane %v126_v53, %v84_v63  ;;  %v3075_v56 = vld [vmem:[%s3789_s3 + $0x8] ss:$16 sps:$4 sm:$0xff]  }
  0x12   :  { %2372 = vmatpush3.bf16.msra.mxu0 %v2926_v23  ;;  %3827 = vst [vmem:[#allocation10_spill] sm:$0xff] %v3045_v54  ;;  %3828 = vst [vmem:[#allocation11_spill] sm:$0xff] %v3047_v55  ;;  %v3086_v63 = vld [vmem:[%s3789_s3 + $0x28] ss:$16 sps:$4 sm:$0xff]  }
  0x13   :  { %2373 = vmatprep.subr.bf16.mxu0 %v3794_v8  ;;  %544 = vmatpush1.bf16.msra.mxu1 %v2939_v25 }
  0x14   :  { %545 = vmatprep.subr.bf16.mxu1 %v2955_v29 }
  0x16   :  { %2375 = vmatpush3.bf16.msra.mxu0 %v2948_v28 }
  0x17   :  { %2376 = vmatprep.subr.bf16.mxu0 %v3794_v8  ;;  %546 = vmatpush1.bf16.msra.mxu1 %v2960_v30 }
  0x18   :  { %547 = vmatprep.subr.bf16.mxu1 %v2972_v33 }
  0x1a   :  { %2378 = vmatpush3.bf16.msra.mxu0 %v2975_v34 }
  0x1b   :  { %2379 = vmatprep.subr.bf16.mxu0 %v3794_v8  ;;  %548 = vmatpush1.bf16.msra.mxu1 %v2989_v38 }
  0x1c   :  { %549 = vmatprep.subr.bf16.mxu1 %v2998_v40 }
  0x1e   :  { %2381 = vmatpush3.bf16.msra.mxu0 %v2993_v39 }
  0x1f   :  { %2382 = vmatprep.subr.bf16.mxu0 %v3794_v8  ;;  %550 = vmatpush1.bf16.msra.mxu1 %v3011_v43 }
  0x20   :  { %551 = vmatprep.subr.bf16.mxu1 %v3020_v45 }
  0x22   :  { %2384 = vmatpush3.bf16.msra.mxu0 %v3015_v44 }
  0x23   :  { %578 = vmatprep.subr.bf16.mxu0 %v3026_v46  ;;  %552 = vmatpush1.bf16.msra.mxu1 %v3032_v47 }
  0x24   :  { %2385 = vmatprep.subr.bf16.mxu1 %v3794_v8 }
  0x81   :  { %v36_v59 = vpop.permute.xlu0 %35 }
  0x82   :  { %v94_v60 = vmul.f32 %v3045_v54, %v36_v59  ;;  %v95_v61 = vmul.f32 %v3047_v55, %v36_v59  ;;  %v97_v6 = vmul.f32 %v3055_v62, %v36_v59  ;;  %v96_v17 = vmul.f32 %v3062_v11, %v36_v59 }
  0x84   :  { %v148_v1 = vadd.f32 %v3049_v57, %v94_v60  ;;  %v149_v2 = vadd.f32 %v3051_v58, %v95_v61  ;;  %v151_v12 = vadd.f32 %v3059_v5, %v97_v6  ;;  %v150_v22 = vadd.f32 %v3065_v16, %v96_v17  ;;  %v3080_v60 = vld [vmem:[%s3789_s3 + $0x2c] ss:$16 sps:$4 sm:$0xff]  }
  0x85   :  { %v3123_v6 = vld [vmem:[%s3789_s3 + $0x8c] ss:$16 sps:$4 sm:$0xff]  }
  0x86   :  { %v1880_v3 = vmul.f32 -1.442695, %v148_v1  ;;  %v1881_v4 = vmul.f32 -1.442695, %v149_v2  ;;  %v1882_v21 = vmul.f32 -1.442695, %v151_v12 }
  0x87   :  { %v3093_v1 = vld [vmem:[%s3789_s3 + $0x4c] ss:$16 sps:$4 sm:$0xff]   ;;  %v3103_v2 = vld [vmem:[%s3789_s3 + $0x48] ss:$16 sps:$4 sm:$0xff]  }
  0x88   :  { %2607 = vpow2.f32 %v1880_v3  ;;  %v3109_v3 = vld [vmem:[%s3789_s3 + $0x6c] ss:$16 sps:$4 sm:$0xff]   ;;  %v3131_v12 = vld [vmem:[%s3789_s3 + $0x88] ss:$16 sps:$4 sm:$0xff]  }
  0x89   :  { %2609 = vpow2.f32 %v1881_v4  ;;  %v3117_v4 = vld [vmem:[%s3789_s3 + $0x68] ss:$16 sps:$4 sm:$0xff]   ;;  %v3137_v17 = vld [vmem:[%s3789_s3 + $0xac] ss:$16 sps:$4 sm:$0xff]  }
  0x8a   :  { %2611 = vpow2.f32 %v1882_v21  ;;  %v3145_v21 = vld [vmem:[%s3789_s3 + $0xa8] ss:$16 sps:$4 sm:$0xff]  }
  0x8b   :  { %2613 = vtanh.f32 %v150_v22  ;;  %v3151_v22 = vld [vmem:[%s3789_s3 + $0xcc] ss:$16 sps:$4 sm:$0xff]  }
  0x92   :  { %v2608_v26 = vpop.eup %2607 }
  0x93   :  { %v2610_v27 = vpop.eup %2609  ;;  %v268_v31 = vadd.f32 1.0, %v2608_v26  ;;  %v3159_v26 = vld [vmem:[%s3789_s3 + $0xc8] ss:$16 sps:$4 sm:$0xff]  }
  0x94   :  { %v274_v32 = vadd.f32 1.0, %v2610_v27  ;;  %v2612_v35 = vpop.eup %2611  ;;  %v3165_v27 = vld [vmem:[%s3789_s3 + $0xec] ss:$16 sps:$4 sm:$0xff]  }
  0x95   :  { %2615 = vrcp.f32 %v268_v31  ;;  %v2614_v36 = vpop.eup %2613  ;;  %v281_v48 = vadd.f32 1.0, %v2612_v35  ;;  %v3173_v31 = vld [vmem:[%s3789_s3 + $0xe8] ss:$16 sps:$4 sm:$0xff]  }
  0x96   :  { %2617 = vrcp.f32 %v274_v32  ;;  %v26_v32 = vld [vmem:[%s3787_s0 + $0x10] sm:$0xff]  ;;  %v27_v35 = vld [vmem:[%s3787_s0 + $0x18] sm:$0xff] }
  0x97   :  { %2619 = vrcp.f32 %v281_v48  ;;  %45 = vperm.xlu1 %2558, %v26_v32   ;;  %v41_v48 = vpop.permute.xlu0 %40 }
  0x98   :  { %v98_v32 = vmul.f32 %v3045_v54, %v41_v48  ;;  %v100_v54 = vmul.f32 %v3062_v11, %v41_v48 }
  0x9b   :  { %50 = vperm.xlu1 %2558, %v27_v35  }
  0x9f   :  { %v2616_v41 = vpop.eup %2615 }
  0xa0   :  { %v2618_v42 = vpop.eup %2617  ;;  %v285_v49 = vmul.f32 %v2616_v41, %v2614_v36  ;;  %v29_v36 = vld [vmem:[%s3787_s0 + $0x28] sm:$0xff]  ;;  %v31_v41 = vld [vmem:[%s3787_s0 + $0x38] sm:$0xff] }
  0xa1   :  { %v284_v50 = vmul.f32 0.0, %v2618_v42  ;;  %v2620_v52 = vpop.eup %2619  ;;  %60 = vperm.xlu1 %2558, %v29_v36   ;;  %v3214_v42 = vld [vmem:[%s3792_s5] ss:$0 sm:$0xff] }
  0xa2   :  { %3829 = vst [vmem:[#allocation12_spill] sm:$0xff] %v3214_v42 }
  0xa3   :  { %v3069_v51 = vadd.f32 %v285_v49, %v284_v50 }
  0xa5   :  { %2621 = vtanh.f32 %v3069_v51  ;;  %70 = vperm.xlu1 %2558, %v31_v41  }
  0xaf   :  { %v2622_v53 = vpop.eup %2621 }
  0xb0   :  { %v288_v59 = vmul.f32 %v2622_v53, %v2620_v52 }
  0xb2   :  { %2114 = vmatmul.mubr.f32.vlgmr.msra.gmra.mrb[0].mxu0 %v288_v59  ;;  %v372_v61 = vpack.c.bf16 %v288_v59, %v288_v59  ;;  %v99_v59 = vmul.f32 %v3047_v55, %v41_v48 }
  0xb3   :  { %579 = vmatpush1.bf16.msra.mxu0 %v3075_v56  ;;  %610 = vmatprep.mubr.bf16.mxu0 %v3798_v0 }
  0xb4   :  { %570 = vmatmul.mubr.bf16.vlgmr.msra.gmra.mrb[0].mxu1 %v372_v61  ;;  %580 = vmatprep.subr.bf16.mxu0 %v3080_v60 }
  0xb5   :  { %2387 = vmatpush3.bf16.msra.mxu1 %v2860_v7  ;;  %2148 = vmatprep.mubr.msk.f32.mxu1 %vm2802_vm0, %v3796_v37  ;;  %v152_v37 = vadd.f32 %v3049_v57, %v98_v32 }
  0xb6   :  { %2388 = vmatprep.subr.bf16.mxu1 %v3794_v8 }
  0xb7   :  { %581 = vmatpush1.bf16.msra.mxu0 %v3086_v63 }
  0xb8   :  { %582 = vmatprep.subr.bf16.mxu0 %v3093_v1 }
  0xb9   :  { %2390 = vmatpush3.bf16.msra.mxu1 %v2882_v13 }
  0xba   :  { %2391 = vmatprep.subr.bf16.mxu1 %v3794_v8 }
  0xbb   :  { %583 = vmatpush1.bf16.msra.mxu0 %v3103_v2 }
  0xbc   :  { %584 = vmatprep.subr.bf16.mxu0 %v3109_v3 }
  0xbd   :  { %2393 = vmatpush3.bf16.msra.mxu1 %v2904_v18 }
  0xbe   :  { %2394 = vmatprep.subr.bf16.mxu1 %v3794_v8 }
  0xbf   :  { %585 = vmatpush1.bf16.msra.mxu0 %v3117_v4 }
  0xc0   :  { %586 = vmatprep.subr.bf16.mxu0 %v3123_v6 }
  0xc1   :  { %2396 = vmatpush3.bf16.msra.mxu1 %v2926_v23 }
  0xc2   :  { %2397 = vmatprep.subr.bf16.mxu1 %v3794_v8 }
  0xc3   :  { %587 = vmatpush1.bf16.msra.mxu0 %v3131_v12 }
  0xc4   :  { %588 = vmatprep.subr.bf16.mxu0 %v3137_v17 }
  0xc5   :  { %2399 = vmatpush3.bf16.msra.mxu1 %v2948_v28 }
  0xc6   :  { %2400 = vmatprep.subr.bf16.mxu1 %v3794_v8 }
  0xc7   :  { %589 = vmatpush1.bf16.msra.mxu0 %v3145_v21 }
  0xc8   :  { %590 = vmatprep.subr.bf16.mxu0 %v3151_v22 }
  0xc9   :  { %2402 = vmatpush3.bf16.msra.mxu1 %v2975_v34 }
  0xca   :  { %2403 = vmatprep.subr.bf16.mxu1 %v3794_v8 }
  0xcb   :  { %591 = vmatpush1.bf16.msra.mxu0 %v3159_v26 }
  0xcc   :  { %592 = vmatprep.subr.bf16.mxu0 %v3165_v27 }
  0xcd   :  { %2405 = vmatpush3.bf16.msra.mxu1 %v2993_v39 }
  0xce   :  { %2406 = vmatprep.subr.bf16.mxu1 %v3794_v8 }
  0xcf   :  { %593 = vmatpush1.bf16.msra.mxu0 %v3173_v31 }
  0xd0   :  { %729 = vmatprep.subr.bf16.mxu0 %v2867_v9 }
  0xd1   :  { %2408 = vmatpush3.bf16.msra.mxu1 %v3015_v44 }
  0xd2   :  { %611 = vmatmul.mubr.bf16.vlgmr.msra.gmra.mrb[4].mxu0 %v372_v61  ;;  %770 = vmatprep.subr.bf16.mxu1 %v3026_v46 }
  0xd3   :  { %730 = vmatpush1.bf16.msra.mxu0 %v2873_v10  ;;  %761 = vmatprep.mubr.bf16.mxu0 %v3798_v0 }
  0xd4   :  { %731 = vmatprep.subr.bf16.mxu0 %v2889_v14 }
  0xd7   :  { %732 = vmatpush1.bf16.msra.mxu0 %v2895_v15 }
  0xd8   :  { %733 = vmatprep.subr.bf16.mxu0 %v2911_v19 }
  0xdb   :  { %734 = vmatpush1.bf16.msra.mxu0 %v2917_v20 }
  0xdc   :  { %735 = vmatprep.subr.bf16.mxu0 %v2933_v24 }
  0xdf   :  { %736 = vmatpush1.bf16.msra.mxu0 %v2939_v25 }
  0xe0   :  { %737 = vmatprep.subr.bf16.mxu0 %v2955_v29 }
  0xe3   :  { %738 = vmatpush1.bf16.msra.mxu0 %v2960_v30 }
  0xe4   :  { %739 = vmatprep.subr.bf16.mxu0 %v2972_v33 }
  0xe7   :  { %740 = vmatpush1.bf16.msra.mxu0 %v2989_v38 }
  0xe8   :  { %741 = vmatprep.subr.bf16.mxu0 %v2998_v40 }
  0xeb   :  { %742 = vmatpush1.bf16.msra.mxu0 %v3011_v43 }
  0xec   :  { %743 = vmatprep.subr.bf16.mxu0 %v3020_v45 }
  0xef   :  { %744 = vmatpush1.bf16.msra.mxu0 %v3032_v47 }
  0xf0   :  { %2409 = vmatprep.subr.bf16.mxu0 %v3794_v8  ;;  %v153_v8 = vadd.f32 %v3051_v58, %v99_v59 }
 0x185   :  { %v361_v49 = vpop.f32.mrb[0].mxu0 }
 0x186   :  { %v362_v50 = vadd.f32 %v3214_v42, %v361_v49  ;;  %v2115_v52 = vpop.f32.mrb[1].mxu0 }
 0x187   :  { %v571_v53 = vpop.f32.mrb[0].mxu1 }
 0x188   :  { %v1884_v61 = vmul.f32 -1.442695, %v362_v50  ;;  %v573_v35 = vpop.f32.mrb[1].mxu1  ;;  %v619_v47 = vadd.f32 %v571_v53, %v152_v37 }
 0x189   :  { %v575_v36 = vpop.f32.mrb[2].mxu1  ;;  %v620_v0 = vadd.f32 %v573_v35, %v153_v8 }
 0x18a   :  { %2623 = vpow2.f32 %v1884_v61  ;;  %v576_v41 = vpop.f32.mrb[3].mxu1  ;;  %v1917_v43 = vmul.f32 -1.442695, %v619_v47  ;;  %v101_v61 = vmul.f32 %v3055_v62, %v41_v48 }
 0x18b   :  { %v1918_v45 = vmul.f32 -1.442695, %v620_v0  ;;  %v154_v0 = vadd.f32 %v3065_v16, %v100_v54 }
 0x18d   :  { %2625 = vpow2.f32 %v1918_v45  ;;  %v155_v45 = vadd.f32 %v3059_v5, %v101_v61 }
 0x18e   :  { %2627 = vpow2.f32 %v1917_v43 }
 0x194   :  { %v2624_v49 = vpop.eup %2623 }
 0x195   :  { %v368_v52 = vadd.f32 1.0, %v2624_v49 }
 0x197   :  { %2629 = vrcp.f32 %v368_v52  ;;  %v2626_v50 = vpop.eup %2625 }
 0x198   :  { %v2628_v42 = vpop.eup %2627  ;;  %v632_v8 = vadd.f32 1.0, %v2626_v50 }
 0x199   :  { %v626_v37 = vadd.f32 1.0, %v2628_v42 }
 0x19a   :  { %2631 = vrcp.f32 %v632_v8 }
 0x19b   :  { %2633 = vrcp.f32 %v626_v37 }
 0x1a1   :  { %v2630_v36 = vpop.eup %2629 }
 0x1a2   :  { %371 = vst [vmem:[%s3793_s6] sm:$0xff] %v2630_v36 }
 0x1a4   :  { %v2632_v41 = vpop.eup %2631 }
 0x1a5   :  { %v612_v47 = vpop.f32.mrb[4].mxu0  ;;  %v2634_v49 = vpop.eup %2633  ;;  %v642_v42 = vmul.f32 %v2632_v41, %v3069_v51  ;;  %v3831_v51 = vmov 0.0  }
 0x1a6   :  { %v621_v43 = vadd.f32 %v612_v47, %v154_v0  ;;  %v614_v53 = vpop.f32.mrb[5].mxu0 }
 0x1a7   :  { %v622_v59 = vadd.f32 %v614_v53, %v155_v45  ;;  %v616_v32 = vpop.f32.mrb[6].mxu0  ;;  %v3830_v45 = vmov 0   ;;  %v3833_v53 = vld [vmem:[#allocation7_spill] sm:$0xff] }
 0x1a8   :  { %2635 = vtanh.f32 %v621_v43  ;;  %v617_v35 = vpop.f32.mrb[7].mxu0  ;;  %v3832_v43 = vmov 0.0|0.0   ;;  %v3835_v32 = vld [vmem:[#allocation9_spill] sm:$0xff] }
 0x1a9   :  { %v1919_v48 = vmul.f32 -1.442695, %v622_v59  ;;  %v3834_v59 = vld [vmem:[#allocation8_spill] sm:$0xff]  ;;  %v46_v35 = vpop.permute.xlu1 %45 }
 0x1aa   :  { %v103_v41 = vmul.f32 %v3047_v55, %v46_v35 }
 0x1ab   :  { %2637 = vpow2.f32 %v1919_v48 }
 0x1b2   :  { %v2636_v52 = vpop.eup %2635 }
 0x1b3   :  { %v643_v50 = vmul.f32 %v2636_v52, %v2634_v49  ;;  %v3836_v49 = vld [vmem:[#allocation12_spill] sm:$0xff] }
 0x1b5   :  { %v2638_v54 = vpop.eup %2637  ;;  %v3229_v36 = vadd.f32 %v643_v50, %v642_v42  ;;  %v3837_v50 = vld [vmem:[#allocation10_spill] sm:$0xff] }
 0x1b6   :  { %v639_v61 = vadd.f32 1.0, %v2638_v54  ;;  %v102_v54 = vmul.f32 %v3837_v50, %v46_v35 }
 0x1b7   :  { %2639 = vtanh.f32 %v3229_v36 }
 0x1b8   :  { %2641 = vrcp.f32 %v639_v61 }
 0x1c1   :  { %v2640_v8 = vpop.eup %2639 }
 0x1c2   :  { %v2642_v37 = vpop.eup %2641 }
 0x1c3   :  { %v646_v0 = vmul.f32 %v2642_v37, %v2640_v8 }
 0x1c5   :  { %2149 = vmatmul.mubr.f32.vlgmr.msra.gmra.mrb[4].mxu1 %v646_v0  ;;  %v724_v47 = vpack.c.bf16 %v646_v0, %v646_v0  ;;  %v157_v0 = vadd.f32 %v3051_v58, %v103_v41  ;;  %v105_v41 = vmul.f32 %v3055_v62, %v46_v35 }
 0x1c6   :  { %771 = vmatpush1.bf16.msra.mxu1 %v3075_v56  ;;  %802 = vmatprep.mubr.bf16.mxu1 %v3830_v45 }
 0x1c7   :  { %762 = vmatmul.mubr.bf16.vlgmr.msra.gmra.mrb[8].mxu0 %v724_v47  ;;  %772 = vmatprep.subr.bf16.mxu1 %v3080_v60 }
 0x1c8   :  { %2411 = vmatpush3.bf16.msra.mxu0 %v2860_v7  ;;  %2183 = vmatprep.mubr.msk.f32.mxu0 %vm2802_vm0, %v3831_v51 }
 0x1c9   :  { %2412 = vmatprep.subr.bf16.mxu0 %v3832_v43 }
 0x1ca   :  { %773 = vmatpush1.bf16.msra.mxu1 %v3086_v63 }
 0x1cb   :  { %774 = vmatprep.subr.bf16.mxu1 %v3093_v1 }
 0x1cc   :  { %2414 = vmatpush3.bf16.msra.mxu0 %v2882_v13 }
 0x1cd   :  { %2415 = vmatprep.subr.bf16.mxu0 %v3832_v43 }
 0x1ce   :  { %775 = vmatpush1.bf16.msra.mxu1 %v3103_v2 }
 0x1cf   :  { %776 = vmatprep.subr.bf16.mxu1 %v3109_v3 }
 0x1d0   :  { %2417 = vmatpush3.bf16.msra.mxu0 %v2904_v18 }
 0x1d1   :  { %2418 = vmatprep.subr.bf16.mxu0 %v3832_v43 }
 0x1d2   :  { %777 = vmatpush1.bf16.msra.mxu1 %v3117_v4 }
 0x1d3   :  { %778 = vmatprep.subr.bf16.mxu1 %v3123_v6 }
 0x1d4   :  { %2420 = vmatpush3.bf16.msra.mxu0 %v2926_v23 }
 0x1d5   :  { %2421 = vmatprep.subr.bf16.mxu0 %v3832_v43 }
 0x1d6   :  { %779 = vmatpush1.bf16.msra.mxu1 %v3131_v12 }
 0x1d7   :  { %780 = vmatprep.subr.bf16.mxu1 %v3137_v17 }
 0x1d8   :  { %2423 = vmatpush3.bf16.msra.mxu0 %v2948_v28 }
 0x1d9   :  { %2424 = vmatprep.subr.bf16.mxu0 %v3832_v43 }
 0x1da   :  { %781 = vmatpush1.bf16.msra.mxu1 %v3145_v21 }
 0x1db   :  { %782 = vmatprep.subr.bf16.mxu1 %v3151_v22 }
 0x1dc   :  { %2426 = vmatpush3.bf16.msra.mxu0 %v2975_v34 }
 0x1dd   :  { %2427 = vmatprep.subr.bf16.mxu0 %v3832_v43 }
 0x1de   :  { %783 = vmatpush1.bf16.msra.mxu1 %v3159_v26 }
 0x1df   :  { %784 = vmatprep.subr.bf16.mxu1 %v3165_v27 }
 0x1e0   :  { %2429 = vmatpush3.bf16.msra.mxu0 %v2993_v39 }
 0x1e1   :  { %2430 = vmatprep.subr.bf16.mxu0 %v3832_v43 }
 0x1e2   :  { %785 = vmatpush1.bf16.msra.mxu1 %v3173_v31 }
 0x1e3   :  { %921 = vmatprep.subr.bf16.mxu1 %v2867_v9 }
 0x1e4   :  { %2432 = vmatpush3.bf16.msra.mxu0 %v3015_v44 }
 0x1e5   :  { %803 = vmatmul.mubr.bf16.vlgmr.msra.gmra.mrb[8].mxu1 %v724_v47  ;;  %962 = vmatprep.subr.bf16.mxu0 %v3026_v46 }
 0x1e6   :  { %922 = vmatpush1.bf16.msra.mxu1 %v2873_v10  ;;  %953 = vmatprep.mubr.bf16.mxu1 %v3830_v45 }
 0x1e7   :  { %923 = vmatprep.subr.bf16.mxu1 %v2889_v14 }
 0x1ea   :  { %924 = vmatpush1.bf16.msra.mxu1 %v2895_v15 }
 0x1eb   :  { %925 = vmatprep.subr.bf16.mxu1 %v2911_v19 }
 0x1ee   :  { %926 = vmatpush1.bf16.msra.mxu1 %v2917_v20 }
 0x1ef   :  { %927 = vmatprep.subr.bf16.mxu1 %v2933_v24 }
 0x1f2   :  { %928 = vmatpush1.bf16.msra.mxu1 %v2939_v25 }
 0x1f3   :  { %929 = vmatprep.subr.bf16.mxu1 %v2955_v29 }
 0x1f6   :  { %930 = vmatpush1.bf16.msra.mxu1 %v2960_v30 }
 0x1f7   :  { %931 = vmatprep.subr.bf16.mxu1 %v2972_v33 }
 0x1fa   :  { %932 = vmatpush1.bf16.msra.mxu1 %v2989_v38 }
 0x1fb   :  { %933 = vmatprep.subr.bf16.mxu1 %v2998_v40 }
 0x1fe   :  { %934 = vmatpush1.bf16.msra.mxu1 %v3833_v53 }
 0x1ff   :  { %935 = vmatprep.subr.bf16.mxu1 %v3834_v59 }
 0x202   :  { %936 = vmatpush1.bf16.msra.mxu1 %v3835_v32  ;;  %v156_v32 = vadd.f32 %v3049_v57, %v102_v54 }
 0x203   :  { %2433 = vmatprep.subr.bf16.mxu1 %v3832_v43 }
 0x298   :  { %v713_v48 = vpop.f32.mrb[4].mxu1 }
 0x299   :  { %v714_v52 = vadd.f32 %v3836_v49, %v713_v48  ;;  %v2150_v42 = vpop.f32.mrb[5].mxu1 }
 0x29a   :  { %v763_v61 = vpop.f32.mrb[8].mxu0 }
 0x29b   :  { %v1920_v8 = vmul.f32 -1.442695, %v714_v52  ;;  %v765_v37 = vpop.f32.mrb[9].mxu0  ;;  %v811_v40 = vadd.f32 %v763_v61, %v156_v32  ;;  %v104_v52 = vmul.f32 %v3062_v11, %v46_v35 }
 0x29c   :  { %v767_v47 = vpop.f32.mrb[10].mxu0  ;;  %v812_v53 = vadd.f32 %v765_v37, %v157_v0 }
 0x29d   :  { %2643 = vpow2.f32 %v1920_v8  ;;  %v768_v59 = vpop.f32.mrb[11].mxu0  ;;  %v1921_v33 = vmul.f32 -1.442695, %v811_v40  ;;  %v158_v40 = vadd.f32 %v3065_v16, %v104_v52 }
 0x29e   :  { %v1922_v38 = vmul.f32 -1.442695, %v812_v53 }
 0x2a0   :  { %2645 = vpow2.f32 %v1922_v38  ;;  %v159_v38 = vadd.f32 %v3059_v5, %v105_v41 }
 0x2a1   :  { %2647 = vpow2.f32 %v1921_v33 }
 0x2a7   :  { %v2644_v55 = vpop.eup %2643 }
 0x2a8   :  { %v720_v30 = vadd.f32 1.0, %v2644_v55 }
 0x2aa   :  { %2649 = vrcp.f32 %v720_v30  ;;  %v2646_v48 = vpop.eup %2645 }
 0x2ab   :  { %v2648_v42 = vpop.eup %2647  ;;  %v824_v59 = vadd.f32 1.0, %v2646_v48 }
 0x2ac   :  { %v818_v32 = vadd.f32 1.0, %v2648_v42 }
 0x2ad   :  { %2651 = vrcp.f32 %v824_v59 }
 0x2ae   :  { %2653 = vrcp.f32 %v818_v32 }
 0x2b4   :  { %v2650_v50 = vpop.eup %2649 }
 0x2b5   :  { %723 = vst [vmem:[%s3793_s6 + $0x8] sm:$0xff] %v2650_v50 }
 0x2b7   :  { %v2652_v8 = vpop.eup %2651 }
 0x2b8   :  { %v804_v53 = vpop.f32.mrb[8].mxu1  ;;  %v2654_v37 = vpop.eup %2653  ;;  %v834_v0 = vmul.f32 %v2652_v8, %v3229_v36  ;;  %v3839_v36 = vld [vmem:[#allocation4_spill] sm:$0xff] }
 0x2b9   :  { %v813_v30 = vadd.f32 %v804_v53, %v158_v40  ;;  %v806_v33 = vpop.f32.mrb[9].mxu1  ;;  %v3841_v53 = vld [vmem:[#allocation6_spill] sm:$0xff] }
 0x2ba   :  { %v814_v55 = vadd.f32 %v806_v33, %v159_v38  ;;  %v808_v54 = vpop.f32.mrb[10].mxu1 }
 0x2bb   :  { %2655 = vtanh.f32 %v813_v30  ;;  %v809_v61 = vpop.f32.mrb[11].mxu1 }
 0x2bc   :  { %v1923_v35 = vmul.f32 -1.442695, %v814_v55  ;;  %v3845_v55 = vld [vmem:[#allocation11_spill] sm:$0xff] }
 0x2be   :  { %2657 = vpow2.f32 %v1923_v35  ;;  %v3846_v35 = vld [vmem:[#allocation10_spill] sm:$0xff] }
 0x2c5   :  { %v2656_v50 = vpop.eup %2655 }
 0x2c6   :  { %v835_v47 = vmul.f32 %v2656_v50, %v2654_v37 }
 0x2c8   :  { %v2658_v48 = vpop.eup %2657  ;;  %v3297_v42 = vadd.f32 %v835_v47, %v834_v0 }
 0x2c9   :  { %v831_v52 = vadd.f32 1.0, %v2658_v48 }
 0x2ca   :  { %2659 = vtanh.f32 %v3297_v42 }
 0x2cb   :  { %2661 = vrcp.f32 %v831_v52 }
 0x2d4   :  { %v2660_v41 = vpop.eup %2659 }
 0x2d5   :  { %v2662_v59 = vpop.eup %2661 }
 0x2d6   :  { %v838_v32 = vmul.f32 %v2662_v59, %v2660_v41 }
 0x2d8   :  { %2184 = vmatmul.mubr.f32.vlgmr.msra.gmra.mrb[2].mxu0 %v838_v32  ;;  %v916_v40 = vpack.c.bf16 %v838_v32, %v838_v32 }
 0x2d9   :  { %963 = vmatpush1.bf16.msra.mxu0 %v3075_v56  ;;  %994 = vmatprep.mubr.bf16.mxu0 %v3830_v45 }
 0x2da   :  { %954 = vmatmul.mubr.bf16.vlgmr.msra.gmra.mrb[12].mxu1 %v916_v40  ;;  %964 = vmatprep.subr.bf16.mxu0 %v3080_v60 }
 0x2db   :  { %2435 = vmatpush3.bf16.msra.mxu1 %v2860_v7  ;;  %2218 = vmatprep.mubr.msk.f32.mxu1 %vm2802_vm0, %v3831_v51 }
 0x2dc   :  { %2436 = vmatprep.subr.bf16.mxu1 %v3832_v43 }
 0x2dd   :  { %965 = vmatpush1.bf16.msra.mxu0 %v3086_v63 }
 0x2de   :  { %966 = vmatprep.subr.bf16.mxu0 %v3093_v1 }
 0x2df   :  { %2438 = vmatpush3.bf16.msra.mxu1 %v2882_v13 }
 0x2e0   :  { %2439 = vmatprep.subr.bf16.mxu1 %v3832_v43 }
 0x2e1   :  { %967 = vmatpush1.bf16.msra.mxu0 %v3103_v2 }
 0x2e2   :  { %968 = vmatprep.subr.bf16.mxu0 %v3109_v3 }
 0x2e3   :  { %2441 = vmatpush3.bf16.msra.mxu1 %v2904_v18 }
 0x2e4   :  { %2442 = vmatprep.subr.bf16.mxu1 %v3832_v43 }
 0x2e5   :  { %969 = vmatpush1.bf16.msra.mxu0 %v3117_v4 }
 0x2e6   :  { %970 = vmatprep.subr.bf16.mxu0 %v3123_v6 }
 0x2e7   :  { %2444 = vmatpush3.bf16.msra.mxu1 %v2926_v23 }
 0x2e8   :  { %2445 = vmatprep.subr.bf16.mxu1 %v3832_v43 }
 0x2e9   :  { %971 = vmatpush1.bf16.msra.mxu0 %v3131_v12 }
 0x2ea   :  { %972 = vmatprep.subr.bf16.mxu0 %v3137_v17 }
 0x2eb   :  { %2447 = vmatpush3.bf16.msra.mxu1 %v2948_v28 }
 0x2ec   :  { %2448 = vmatprep.subr.bf16.mxu1 %v3832_v43 }
 0x2ed   :  { %973 = vmatpush1.bf16.msra.mxu0 %v3145_v21 }
 0x2ee   :  { %974 = vmatprep.subr.bf16.mxu0 %v3151_v22 }
 0x2ef   :  { %2450 = vmatpush3.bf16.msra.mxu1 %v2975_v34 }
 0x2f0   :  { %2451 = vmatprep.subr.bf16.mxu1 %v3832_v43 }
 0x2f1   :  { %975 = vmatpush1.bf16.msra.mxu0 %v3159_v26 }
 0x2f2   :  { %976 = vmatprep.subr.bf16.mxu0 %v3165_v27 }
 0x2f3   :  { %2453 = vmatpush3.bf16.msra.mxu1 %v2993_v39 }
 0x2f4   :  { %2454 = vmatprep.subr.bf16.mxu1 %v3832_v43 }
 0x2f5   :  { %977 = vmatpush1.bf16.msra.mxu0 %v3173_v31 }
 0x2f6   :  { %1113 = vmatprep.subr.bf16.mxu0 %v2867_v9  ;;  %v3838_v9 = vld [vmem:[#allocation3_spill] sm:$0xff] }
 0x2f7   :  { %2456 = vmatpush3.bf16.msra.mxu1 %v3015_v44 }
 0x2f8   :  { %995 = vmatmul.mubr.bf16.vlgmr.msra.gmra.mrb[12].mxu0 %v916_v40  ;;  %1154 = vmatprep.subr.bf16.mxu1 %v3026_v46 }
 0x2f9   :  { %1114 = vmatpush1.bf16.msra.mxu0 %v2873_v10  ;;  %1145 = vmatprep.mubr.bf16.mxu0 %v3830_v45  ;;  %v3840_v10 = vld [vmem:[#allocation5_spill] sm:$0xff] }
 0x2fa   :  { %1115 = vmatprep.subr.bf16.mxu0 %v2889_v14  ;;  %v3842_v14 = vld [vmem:[#allocation7_spill] sm:$0xff] }
 0x2fd   :  { %1116 = vmatpush1.bf16.msra.mxu0 %v2895_v15  ;;  %v3843_v15 = vld [vmem:[#allocation8_spill] sm:$0xff] }
 0x2fe   :  { %1117 = vmatprep.subr.bf16.mxu0 %v2911_v19  ;;  %v3844_v19 = vld [vmem:[#allocation9_spill] sm:$0xff] }
 0x301   :  { %1118 = vmatpush1.bf16.msra.mxu0 %v2917_v20 }
 0x302   :  { %1119 = vmatprep.subr.bf16.mxu0 %v2933_v24  ;;  %v51_v24 = vpop.permute.xlu1 %50 }
 0x303   :  { %v107_v54 = vmul.f32 %v3845_v55, %v51_v24  ;;  %v106_v8 = vmul.f32 %v3846_v35, %v51_v24  ;;  %v108_v35 = vmul.f32 %v3062_v11, %v51_v24 }
 0x305   :  { %1120 = vmatpush1.bf16.msra.mxu0 %v2939_v25  ;;  %v161_v47 = vadd.f32 %v3051_v58, %v107_v54  ;;  %v160_v48 = vadd.f32 %v3049_v57, %v106_v8  ;;  %v162_v8 = vadd.f32 %v3065_v16, %v108_v35 }
 0x306   :  { %1121 = vmatprep.subr.bf16.mxu0 %v2955_v29 }
 0x309   :  { %1122 = vmatpush1.bf16.msra.mxu0 %v3838_v9 }
 0x30a   :  { %1123 = vmatprep.subr.bf16.mxu0 %v3839_v36 }
 0x30d   :  { %1124 = vmatpush1.bf16.msra.mxu0 %v3840_v10 }
 0x30e   :  { %1125 = vmatprep.subr.bf16.mxu0 %v3841_v53 }
 0x311   :  { %1126 = vmatpush1.bf16.msra.mxu0 %v3842_v14 }
 0x312   :  { %1127 = vmatprep.subr.bf16.mxu0 %v3843_v15 }
 0x315   :  { %1128 = vmatpush1.bf16.msra.mxu0 %v3844_v19 }
 0x316   :  { %2457 = vmatprep.subr.bf16.mxu0 %v3832_v43 }
 0x3ab   :  { %v905_v20 = vpop.f32.mrb[2].mxu0 }
 0x3ac   :  { %v906_v38 = vadd.f32 %v3836_v49, %v905_v20  ;;  %v2185_v30 = vpop.f32.mrb[3].mxu0 }
 0x3ad   :  { %v955_v33 = vpop.f32.mrb[12].mxu1 }
 0x3ae   :  { %v1924_v61 = vmul.f32 -1.442695, %v906_v38  ;;  %v957_v37 = vpop.f32.mrb[13].mxu1  ;;  %v1003_v41 = vadd.f32 %v955_v33, %v160_v48 }
 0x3af   :  { %v959_v50 = vpop.f32.mrb[14].mxu1  ;;  %v1004_v52 = vadd.f32 %v957_v37, %v161_v47 }
 0x3b0   :  { %2663 = vpow2.f32 %v1924_v61  ;;  %v960_v0 = vpop.f32.mrb[15].mxu1  ;;  %v1925_v32 = vmul.f32 -1.442695, %v1003_v41  ;;  %v109_v61 = vmul.f32 %v3055_v62, %v51_v24 }
 0x3b1   :  { %v1926_v59 = vmul.f32 -1.442695, %v1004_v52 }
 0x3b2   :  { %v163_v0 = vadd.f32 %v3059_v5, %v109_v61 }
 0x3b3   :  { %2665 = vpow2.f32 %v1926_v59 }
 0x3b4   :  { %2667 = vpow2.f32 %v1925_v32 }
 0x3ba   :  { %v2664_v40 = vpop.eup %2663 }
 0x3bb   :  { %v912_v20 = vadd.f32 1.0, %v2664_v40 }
 0x3bd   :  { %2669 = vrcp.f32 %v912_v20  ;;  %v2666_v38 = vpop.eup %2665 }
 0x3be   :  { %v2668_v30 = vpop.eup %2667  ;;  %v1016_v54 = vadd.f32 1.0, %v2666_v38 }
 0x3bf   :  { %v1010_v33 = vadd.f32 1.0, %v2668_v30 }
 0x3c0   :  { %2671 = vrcp.f32 %v1016_v54 }
 0x3c1   :  { %2673 = vrcp.f32 %v1010_v33 }
 0x3c7   :  { %v2670_v50 = vpop.eup %2669 }
 0x3c8   :  { %915 = vst [vmem:[%s3793_s6 + $0x10] sm:$0xff] %v2670_v50 }
 0x3ca   :  { %v2672_v32 = vpop.eup %2671 }
 0x3cb   :  { %v996_v37 = vpop.f32.mrb[12].mxu0  ;;  %v2674_v40 = vpop.eup %2673  ;;  %v1026_v38 = vmul.f32 %v2672_v32, %v3297_v42  ;;  %v3403_v42 = vld [vmem:[%s3789_s3 + $0x4] ss:$16 sps:$4 sm:$0xff]  }
 0x3cc   :  { %v1005_v47 = vadd.f32 %v996_v37, %v162_v8  ;;  %v998_v48 = vpop.f32.mrb[13].mxu0 }
 0x3cd   :  { %v1006_v52 = vadd.f32 %v998_v48, %v163_v0  ;;  %v1000_v41 = vpop.f32.mrb[14].mxu0  ;;  %v3411_v0 = vld [vmem:[%s3789_s3] ss:$16 sps:$4 sm:$0xff]   ;;  %v3430_v48 = vld [vmem:[%s3789_s3 + $0x44] ss:$16 sps:$4 sm:$0xff]  }
 0x3ce   :  { %2675 = vtanh.f32 %v1005_v47  ;;  %v1001_v59 = vpop.f32.mrb[15].mxu0  ;;  %v3418_v47 = vld [vmem:[%s3789_s3 + $0x24] ss:$16 sps:$4 sm:$0xff]  }
 0x3cf   :  { %v1927_v24 = vmul.f32 -1.442695, %v1006_v52  ;;  %v3436_v52 = vld [vmem:[%s3789_s3 + $0x40] ss:$16 sps:$4 sm:$0xff]   ;;  %v3442_v41 = vld [vmem:[%s3789_s3 + $0x64] ss:$16 sps:$4 sm:$0xff]   ;;  %v56_v59 = vpop.permute.xlu0 %55 }
 0x3d1   :  { %2677 = vpow2.f32 %v1927_v24 }
 0x3d8   :  { %v2676_v20 = vpop.eup %2675 }
 0x3d9   :  { %v1027_v30 = vmul.f32 %v2676_v20, %v2674_v40 }
 0x3db   :  { %v2678_v35 = vpop.eup %2677  ;;  %v3365_v50 = vadd.f32 %v1027_v30, %v1026_v38 }
 0x3dc   :  { %v1023_v61 = vadd.f32 1.0, %v2678_v35 }
 0x3dd   :  { %2679 = vtanh.f32 %v3365_v50 }
 0x3de   :  { %2681 = vrcp.f32 %v1023_v61 }
 0x3e7   :  { %v2680_v54 = vpop.eup %2679 }
 0x3e8   :  { %v2682_v33 = vpop.eup %2681 }
 0x3e9   :  { %v1030_v8 = vmul.f32 %v2682_v33, %v2680_v54 }
 0x3eb   :  { %2219 = vmatmul.mubr.f32.vlgmr.msra.gmra.mrb[6].mxu1 %v1030_v8  ;;  %v1108_v37 = vpack.c.bf16 %v1030_v8, %v1030_v8 }
 0x3ec   :  { %1155 = vmatpush1.bf16.msra.mxu1 %v3075_v56  ;;  %1186 = vmatprep.mubr.bf16.mxu1 %v3830_v45 }
 0x3ed   :  { %1146 = vmatmul.mubr.bf16.vlgmr.msra.gmra.mrb[16].mxu0 %v1108_v37  ;;  %1156 = vmatprep.subr.bf16.mxu1 %v3080_v60 }
 0x3ee   :  { %2459 = vmatpush3.bf16.msra.mxu0 %v2860_v7  ;;  %2253 = vmatprep.mubr.msk.f32.mxu0 %vm2802_vm0, %v3831_v51 }
 0x3ef   :  { %2460 = vmatprep.subr.bf16.mxu0 %v3832_v43 }
 0x3f0   :  { %1157 = vmatpush1.bf16.msra.mxu1 %v3086_v63 }
 0x3f1   :  { %1158 = vmatprep.subr.bf16.mxu1 %v3093_v1 }
 0x3f2   :  { %2462 = vmatpush3.bf16.msra.mxu0 %v2882_v13 }
 0x3f3   :  { %2463 = vmatprep.subr.bf16.mxu0 %v3832_v43 }
 0x3f4   :  { %1159 = vmatpush1.bf16.msra.mxu1 %v3103_v2 }
 0x3f5   :  { %1160 = vmatprep.subr.bf16.mxu1 %v3109_v3 }
 0x3f6   :  { %2465 = vmatpush3.bf16.msra.mxu0 %v2904_v18 }
 0x3f7   :  { %2466 = vmatprep.subr.bf16.mxu0 %v3832_v43 }
 0x3f8   :  { %1161 = vmatpush1.bf16.msra.mxu1 %v3117_v4 }
 0x3f9   :  { %1162 = vmatprep.subr.bf16.mxu1 %v3123_v6 }
 0x3fa   :  { %2468 = vmatpush3.bf16.msra.mxu0 %v2926_v23 }
 0x3fb   :  { %2469 = vmatprep.subr.bf16.mxu0 %v3832_v43 }
 0x3fc   :  { %1163 = vmatpush1.bf16.msra.mxu1 %v3131_v12 }
 0x3fd   :  { %1164 = vmatprep.subr.bf16.mxu1 %v3137_v17 }
 0x3fe   :  { %2471 = vmatpush3.bf16.msra.mxu0 %v2948_v28 }
 0x3ff   :  { %2472 = vmatprep.subr.bf16.mxu0 %v3832_v43 }
 0x400   :  { %1165 = vmatpush1.bf16.msra.mxu1 %v3145_v21 }
 0x401   :  { %1166 = vmatprep.subr.bf16.mxu1 %v3151_v22 }
 0x402   :  { %2474 = vmatpush3.bf16.msra.mxu0 %v2975_v34 }
 0x403   :  { %2475 = vmatprep.subr.bf16.mxu0 %v3832_v43 }
 0x404   :  { %1167 = vmatpush1.bf16.msra.mxu1 %v3159_v26 }
 0x405   :  { %1168 = vmatprep.subr.bf16.mxu1 %v3165_v27 }
 0x406   :  { %2477 = vmatpush3.bf16.msra.mxu0 %v2993_v39 }
 0x407   :  { %2478 = vmatprep.subr.bf16.mxu0 %v3832_v43 }
 0x408   :  { %1169 = vmatpush1.bf16.msra.mxu1 %v3173_v31 }
 0x409   :  { %1305 = vmatprep.subr.bf16.mxu1 %v3403_v42 }
 0x40a   :  { %2480 = vmatpush3.bf16.msra.mxu0 %v3015_v44 }
 0x40b   :  { %1187 = vmatmul.mubr.bf16.vlgmr.msra.gmra.mrb[16].mxu1 %v1108_v37  ;;  %1346 = vmatprep.subr.bf16.mxu0 %v3026_v46  ;;  %v3424_v46 = vld [vmem:[%s3789_s3 + $0x20] ss:$16 sps:$4 sm:$0xff]  }
 0x40c   :  { %1306 = vmatpush1.bf16.msra.mxu1 %v3411_v0  ;;  %1337 = vmatprep.mubr.bf16.mxu1 %v3830_v45 }
 0x40d   :  { %1307 = vmatprep.subr.bf16.mxu1 %v3418_v47 }
 0x410   :  { %1308 = vmatpush1.bf16.msra.mxu1 %v3424_v46 }
 0x411   :  { %1309 = vmatprep.subr.bf16.mxu1 %v3430_v48 }
 0x414   :  { %1310 = vmatpush1.bf16.msra.mxu1 %v3436_v52 }
 0x415   :  { %1311 = vmatprep.subr.bf16.mxu1 %v3442_v41 }
 0x418   :  { %1312 = vmatpush1.bf16.msra.mxu1 %v2939_v25 }
 0x419   :  { %1313 = vmatprep.subr.bf16.mxu1 %v2955_v29 }
 0x41c   :  { %1314 = vmatpush1.bf16.msra.mxu1 %v3838_v9 }
 0x41d   :  { %1315 = vmatprep.subr.bf16.mxu1 %v3839_v36  ;;  %v111_v36 = vmul.f32 %v3845_v55, %v56_v59 }
 0x420   :  { %1316 = vmatpush1.bf16.msra.mxu1 %v3840_v10  ;;  %v3847_v10 = vld [vmem:[#allocation10_spill] sm:$0xff] }
 0x421   :  { %1317 = vmatprep.subr.bf16.mxu1 %v3841_v53  ;;  %v110_v40 = vmul.f32 %v3847_v10, %v56_v59 }
 0x424   :  { %1318 = vmatpush1.bf16.msra.mxu1 %v3842_v14 }
 0x425   :  { %1319 = vmatprep.subr.bf16.mxu1 %v3843_v15  ;;  %v165_v15 = vadd.f32 %v3051_v58, %v111_v36 }
 0x428   :  { %1320 = vmatpush1.bf16.msra.mxu1 %v3844_v19  ;;  %v164_v19 = vadd.f32 %v3049_v57, %v110_v40 }
 0x429   :  { %2481 = vmatprep.subr.bf16.mxu1 %v3832_v43 }
 0x4be   :  { %v1097_v25 = vpop.f32.mrb[6].mxu1 }
 0x4bf   :  { %v1098_v29 = vadd.f32 %v3836_v49, %v1097_v25  ;;  %v2220_v24 = vpop.f32.mrb[7].mxu1  ;;  %v112_v25 = vmul.f32 %v3062_v11, %v56_v59 }
 0x4c0   :  { %v1147_v9 = vpop.f32.mrb[16].mxu0  ;;  %v113_v24 = vmul.f32 %v3055_v62, %v56_v59 }
 0x4c1   :  { %v1928_v32 = vmul.f32 -1.442695, %v1098_v29  ;;  %v1149_v53 = vpop.f32.mrb[17].mxu0  ;;  %v1195_v30 = vadd.f32 %v1147_v9, %v164_v19 }
 0x4c2   :  { %v1151_v20 = vpop.f32.mrb[18].mxu0  ;;  %v1196_v38 = vadd.f32 %v1149_v53, %v165_v15  ;;  %v167_v53 = vadd.f32 %v3059_v5, %v113_v24 }
 0x4c3   :  { %2683 = vpow2.f32 %v1928_v32  ;;  %v1152_v14 = vpop.f32.mrb[19].mxu0  ;;  %v1929_v61 = vmul.f32 -1.442695, %v1195_v30  ;;  %v166_v32 = vadd.f32 %v3065_v16, %v112_v25 }
 0x4c4   :  { %v1930_v35 = vmul.f32 -1.442695, %v1196_v38 }
 0x4c6   :  { %2685 = vpow2.f32 %v1930_v35 }
 0x4c7   :  { %2687 = vpow2.f32 %v1929_v61 }
 0x4cd   :  { %v2684_v54 = vpop.eup %2683 }
 0x4ce   :  { %v1104_v33 = vadd.f32 1.0, %v2684_v54 }
 0x4d0   :  { %2689 = vrcp.f32 %v1104_v33  ;;  %v2686_v8 = vpop.eup %2685 }
 0x4d1   :  { %v2688_v37 = vpop.eup %2687  ;;  %v1208_v36 = vadd.f32 1.0, %v2686_v8 }
 0x4d2   :  { %v1202_v9 = vadd.f32 1.0, %v2688_v37 }
 0x4d3   :  { %2691 = vrcp.f32 %v1208_v36 }
 0x4d4   :  { %2693 = vrcp.f32 %v1202_v9 }
 0x4da   :  { %v2690_v29 = vpop.eup %2689 }
 0x4db   :  { %1107 = vst [vmem:[%s3793_s6 + $0x18] sm:$0xff] %v2690_v29 }
 0x4dd   :  { %v2692_v30 = vpop.eup %2691 }
 0x4de   :  { %v1188_v40 = vpop.f32.mrb[16].mxu1  ;;  %v2694_v35 = vpop.eup %2693  ;;  %v1218_v54 = vmul.f32 %v2692_v30, %v3365_v50 }
 0x4df   :  { %v1197_v20 = vadd.f32 %v1188_v40, %v166_v32  ;;  %v1190_v14 = vpop.f32.mrb[17].mxu1 }
 0x4e0   :  { %v1198_v15 = vadd.f32 %v1190_v14, %v167_v53  ;;  %v1192_v19 = vpop.f32.mrb[18].mxu1 }
 0x4e1   :  { %2695 = vtanh.f32 %v1197_v20  ;;  %v1193_v38 = vpop.f32.mrb[19].mxu1 }
 0x4e2   :  { %v1931_v59 = vmul.f32 -1.442695, %v1198_v15 }
 0x4e4   :  { %2697 = vpow2.f32 %v1931_v59 }
 0x4eb   :  { %v2696_v61 = vpop.eup %2695 }
 0x4ec   :  { %v1219_v33 = vmul.f32 %v2696_v61, %v2694_v35 }
 0x4ee   :  { %v2698_v8 = vpop.eup %2697  ;;  %v3468_v37 = vadd.f32 %v1219_v33, %v1218_v54 }
 0x4ef   :  { %v1215_v25 = vadd.f32 1.0, %v2698_v8 }
 0x4f0   :  { %2699 = vtanh.f32 %v3468_v37 }
 0x4f1   :  { %2701 = vrcp.f32 %v1215_v25 }
 0x4fa   :  { %v2700_v29 = vpop.eup %2699 }
 0x4fb   :  { %v2702_v24 = vpop.eup %2701 }
 0x4fc   :  { %v1222_v36 = vmul.f32 %v2702_v24, %v2700_v29 }
 0x4fe   :  { %2254 = vmatmul.mubr.f32.vlgmr.msra.gmra.mrb[20].mxu0 %v1222_v36  ;;  %v1300_v9 = vpack.c.bf16 %v1222_v36, %v1222_v36 }
 0x4ff   :  { %1347 = vmatpush1.bf16.msra.mxu0 %v3075_v56  ;;  %1378 = vmatprep.mubr.bf16.mxu0 %v3830_v45  ;;  %v3508_v56 = vld [vmem:[%s3789_s3 + $0xc] ss:$16 sps:$4 sm:$0xff]  }
 0x500   :  { %1338 = vmatmul.mubr.bf16.vlgmr.msra.gmra.mrb[20].mxu1 %v1300_v9  ;;  %1348 = vmatprep.subr.bf16.mxu0 %v3080_v60  ;;  %v3521_v60 = vld [vmem:[%s3789_s3 + $0x60] ss:$16 sps:$4 sm:$0xff]  }
 0x501   :  { %2483 = vmatpush3.bf16.msra.mxu1 %v2860_v7  ;;  %2288 = vmatprep.mubr.msk.f32.mxu1 %vm2802_vm0, %v3831_v51 }
 0x502   :  { %2484 = vmatprep.subr.bf16.mxu1 %v3832_v43 }
 0x503   :  { %1349 = vmatpush1.bf16.msra.mxu0 %v3086_v63  ;;  %v3527_v63 = vld [vmem:[%s3789_s3 + $0x84] ss:$16 sps:$4 sm:$0xff]  }
 0x504   :  { %1350 = vmatprep.subr.bf16.mxu0 %v3093_v1  ;;  %v3533_v1 = vld [vmem:[%s3789_s3 + $0x80] ss:$16 sps:$4 sm:$0xff]  }
 0x505   :  { %2486 = vmatpush3.bf16.msra.mxu1 %v2882_v13 }
 0x506   :  { %2487 = vmatprep.subr.bf16.mxu1 %v3832_v43 }
 0x507   :  { %1351 = vmatpush1.bf16.msra.mxu0 %v3103_v2  ;;  %v3539_v2 = vld [vmem:[%s3789_s3 + $0xa4] ss:$16 sps:$4 sm:$0xff]  }
 0x508   :  { %1352 = vmatprep.subr.bf16.mxu0 %v3109_v3  ;;  %v3545_v3 = vld [vmem:[%s3789_s3 + $0xa0] ss:$16 sps:$4 sm:$0xff]  }
 0x509   :  { %2489 = vmatpush3.bf16.msra.mxu1 %v2904_v18 }
 0x50a   :  { %2490 = vmatprep.subr.bf16.mxu1 %v3832_v43 }
 0x50b   :  { %1353 = vmatpush1.bf16.msra.mxu0 %v3117_v4  ;;  %v3551_v4 = vld [vmem:[%s3789_s3 + $0xc4] ss:$16 sps:$4 sm:$0xff]  }
 0x50c   :  { %1354 = vmatprep.subr.bf16.mxu0 %v3123_v6  ;;  %v3557_v6 = vld [vmem:[%s3789_s3 + $0xc0] ss:$16 sps:$4 sm:$0xff]  }
 0x50d   :  { %2492 = vmatpush3.bf16.msra.mxu1 %v2926_v23 }
 0x50e   :  { %2493 = vmatprep.subr.bf16.mxu1 %v3832_v43 }
 0x50f   :  { %1355 = vmatpush1.bf16.msra.mxu0 %v3131_v12  ;;  %v3563_v12 = vld [vmem:[%s3789_s3 + $0xe4] ss:$16 sps:$4 sm:$0xff]  }
 0x510   :  { %1356 = vmatprep.subr.bf16.mxu0 %v3137_v17  ;;  %v3569_v17 = vld [vmem:[%s3789_s3 + $0xe0] ss:$16 sps:$4 sm:$0xff]  }
 0x511   :  { %2495 = vmatpush3.bf16.msra.mxu1 %v2948_v28 }
 0x512   :  { %2496 = vmatprep.subr.bf16.mxu1 %v3832_v43 }
 0x513   :  { %1357 = vmatpush1.bf16.msra.mxu0 %v3145_v21 }
 0x514   :  { %1358 = vmatprep.subr.bf16.mxu0 %v3151_v22  ;;  %v61_v22 = vpop.permute.xlu1 %60 }
 0x515   :  { %2498 = vmatpush3.bf16.msra.mxu1 %v2975_v34  ;;  %v115_v50 = vmul.f32 %v3845_v55, %v61_v22  ;;  %v114_v40 = vmul.f32 %v3847_v10, %v61_v22  ;;  %v116_v8 = vmul.f32 %v3062_v11, %v61_v22  ;;  %v117_v29 = vmul.f32 %v3055_v62, %v61_v22 }
 0x516   :  { %2499 = vmatprep.subr.bf16.mxu1 %v3832_v43 }
 0x517   :  { %1359 = vmatpush1.bf16.msra.mxu0 %v3159_v26  ;;  %v169_v15 = vadd.f32 %v3051_v58, %v115_v50  ;;  %v168_v19 = vadd.f32 %v3049_v57, %v114_v40 }
 0x518   :  { %1360 = vmatprep.subr.bf16.mxu0 %v3165_v27 }
 0x519   :  { %2501 = vmatpush3.bf16.msra.mxu1 %v2993_v39 }
 0x51a   :  { %2502 = vmatprep.subr.bf16.mxu1 %v3832_v43 }
 0x51b   :  { %1361 = vmatpush1.bf16.msra.mxu0 %v3173_v31 }
 0x51c   :  { %1497 = vmatprep.subr.bf16.mxu0 %v3403_v42 }
 0x51d   :  { %2504 = vmatpush3.bf16.msra.mxu1 %v3015_v44 }
 0x51e   :  { %1379 = vmatmul.mubr.bf16.vlgmr.msra.gmra.mrb[24].mxu0 %v1300_v9  ;;  %1538 = vmatprep.subr.bf16.mxu1 %v3508_v56  ;;  %v170_v9 = vadd.f32 %v3065_v16, %v116_v8  ;;  %v3609_v8 = vld [vmem:[%s3789_s3 + $0x28] ss:$16 sps:$4 sm:$0xff]  }
 0x51f   :  { %1498 = vmatpush1.bf16.msra.mxu0 %v3411_v0  ;;  %1529 = vmatprep.mubr.bf16.mxu0 %v3830_v45 }
 0x520   :  { %1499 = vmatprep.subr.bf16.mxu0 %v3418_v47 }
 0x523   :  { %1500 = vmatpush1.bf16.msra.mxu0 %v3424_v46 }
 0x524   :  { %1501 = vmatprep.subr.bf16.mxu0 %v3430_v48 }
 0x527   :  { %1502 = vmatpush1.bf16.msra.mxu0 %v3436_v52 }
 0x528   :  { %1503 = vmatprep.subr.bf16.mxu0 %v3442_v41 }
 0x52b   :  { %1504 = vmatpush1.bf16.msra.mxu0 %v3521_v60 }
 0x52c   :  { %1505 = vmatprep.subr.bf16.mxu0 %v3527_v63 }
 0x52f   :  { %1506 = vmatpush1.bf16.msra.mxu0 %v3533_v1 }
 0x530   :  { %1507 = vmatprep.subr.bf16.mxu0 %v3539_v2 }
 0x533   :  { %1508 = vmatpush1.bf16.msra.mxu0 %v3545_v3 }
 0x534   :  { %1509 = vmatprep.subr.bf16.mxu0 %v3551_v4 }
 0x537   :  { %1510 = vmatpush1.bf16.msra.mxu0 %v3557_v6 }
 0x538   :  { %1511 = vmatprep.subr.bf16.mxu0 %v3563_v12 }
 0x53b   :  { %1512 = vmatpush1.bf16.msra.mxu0 %v3569_v17 }
 0x53c   :  { %2505 = vmatprep.subr.bf16.mxu0 %v3832_v43 }
 0x5d1   :  { %v1289_v21 = vpop.f32.mrb[20].mxu0 }
 0x5d2   :  { %v1290_v26 = vadd.f32 %v3836_v49, %v1289_v21  ;;  %v2255_v27 = vpop.f32.mrb[21].mxu0 }
 0x5d3   :  { %v1339_v31 = vpop.f32.mrb[20].mxu1 }
 0x5d4   :  { %v1932_v32 = vmul.f32 -1.442695, %v1290_v26  ;;  %v1341_v53 = vpop.f32.mrb[21].mxu1  ;;  %v1387_v59 = vadd.f32 %v1339_v31, %v168_v19  ;;  %v171_v26 = vadd.f32 %v3059_v5, %v117_v29  ;;  %v3623_v29 = vld [vmem:[%s3789_s3 + $0x48] ss:$16 sps:$4 sm:$0xff]  }
 0x5d5   :  { %v1343_v20 = vpop.f32.mrb[22].mxu1  ;;  %v1388_v38 = vadd.f32 %v1341_v53, %v169_v15 }
 0x5d6   :  { %2703 = vpow2.f32 %v1932_v32  ;;  %v1344_v14 = vpop.f32.mrb[23].mxu1  ;;  %v1933_v35 = vmul.f32 -1.442695, %v1387_v59 }
 0x5d7   :  { %v1934_v30 = vmul.f32 -1.442695, %v1388_v38 }
 0x5d9   :  { %2705 = vpow2.f32 %v1934_v30 }
 0x5da   :  { %2707 = vpow2.f32 %v1933_v35 }
 0x5e0   :  { %v2704_v49 = vpop.eup %2703 }
 0x5e1   :  { %v1296_v61 = vadd.f32 1.0, %v2704_v49 }
 0x5e3   :  { %2709 = vrcp.f32 %v1296_v61  ;;  %v2706_v54 = vpop.eup %2705 }
 0x5e4   :  { %v2708_v33 = vpop.eup %2707  ;;  %v1400_v24 = vadd.f32 1.0, %v2706_v54 }
 0x5e5   :  { %v1394_v36 = vadd.f32 1.0, %v2708_v33  ;;  %v3592_v33 = vld [vmem:[%s3789_s3 + $0x8] ss:$16 sps:$4 sm:$0xff]  }
 0x5e6   :  { %2711 = vrcp.f32 %v1400_v24  ;;  %v3629_v24 = vld [vmem:[%s3789_s3 + $0x6c] ss:$16 sps:$4 sm:$0xff]  }
 0x5e7   :  { %2713 = vrcp.f32 %v1394_v36  ;;  %v3637_v36 = vld [vmem:[%s3789_s3 + $0x68] ss:$16 sps:$4 sm:$0xff]  }
 0x5ed   :  { %v2710_v25 = vpop.eup %2709 }
 0x5ee   :  { %1299 = vst [vmem:[%s3793_s6 + $0x20] sm:$0xff] %v2710_v25  ;;  %v3615_v25 = vld [vmem:[%s3789_s3 + $0x4c] ss:$16 sps:$4 sm:$0xff]  }
 0x5f0   :  { %v2712_v53 = vpop.eup %2711 }
 0x5f1   :  { %v1380_v21 = vpop.f32.mrb[24].mxu0  ;;  %v2714_v20 = vpop.eup %2713  ;;  %v1410_v15 = vmul.f32 %v2712_v53, %v3468_v37  ;;  %v3599_v37 = vld [vmem:[%s3789_s3 + $0x2c] ss:$16 sps:$4 sm:$0xff]  }
 0x5f2   :  { %v1389_v27 = vadd.f32 %v1380_v21, %v170_v9  ;;  %v1382_v31 = vpop.f32.mrb[25].mxu0  ;;  %v3643_v9 = vld [vmem:[%s3789_s3 + $0x8c] ss:$16 sps:$4 sm:$0xff]   ;;  %v3651_v21 = vld [vmem:[%s3789_s3 + $0x88] ss:$16 sps:$4 sm:$0xff]  }
 0x5f3   :  { %v1390_v50 = vadd.f32 %v1382_v31, %v171_v26  ;;  %v1384_v32 = vpop.f32.mrb[26].mxu0  ;;  %v3657_v26 = vld [vmem:[%s3789_s3 + $0xac] ss:$16 sps:$4 sm:$0xff]  }
 0x5f4   :  { %2715 = vtanh.f32 %v1389_v27  ;;  %v1385_v40 = vpop.f32.mrb[27].mxu0  ;;  %v3665_v27 = vld [vmem:[%s3789_s3 + $0xa8] ss:$16 sps:$4 sm:$0xff]   ;;  %v3671_v31 = vld [vmem:[%s3789_s3 + $0xcc] ss:$16 sps:$4 sm:$0xff]  }
 0x5f5   :  { %v1935_v22 = vmul.f32 -1.442695, %v1390_v50  ;;  %v3679_v50 = vld [vmem:[%s3789_s3 + $0xc8] ss:$16 sps:$4 sm:$0xff]   ;;  %v3685_v32 = vld [vmem:[%s3789_s3 + $0xec] ss:$16 sps:$4 sm:$0xff]  }
 0x5f6   :  { %v3693_v40 = vld [vmem:[%s3789_s3 + $0xe8] ss:$16 sps:$4 sm:$0xff]  }
 0x5f7   :  { %2717 = vpow2.f32 %v1935_v22 }
 0x5fe   :  { %v2716_v14 = vpop.eup %2715 }
 0x5ff   :  { %v1411_v19 = vmul.f32 %v2716_v14, %v2714_v20 }
 0x601   :  { %v2718_v38 = vpop.eup %2717  ;;  %v3586_v59 = vadd.f32 %v1411_v19, %v1410_v15 }
 0x602   :  { %v1407_v30 = vadd.f32 1.0, %v2718_v38 }
 0x603   :  { %2719 = vtanh.f32 %v3586_v59 }
 0x604   :  { %2721 = vrcp.f32 %v1407_v30 }
 0x60d   :  { %v2720_v35 = vpop.eup %2719 }
 0x60e   :  { %v2722_v49 = vpop.eup %2721 }
 0x60f   :  { %v1414_v61 = vmul.f32 %v2722_v49, %v2720_v35 }
 0x611   :  { %2289 = vmatmul.mubr.f32.vlgmr.msra.gmra.mrb[24].mxu1 %v1414_v61  ;;  %v1492_v54 = vpack.c.bf16 %v1414_v61, %v1414_v61 }
 0x612   :  { %1539 = vmatpush1.bf16.msra.mxu1 %v3592_v33  ;;  %1570 = vmatprep.mubr.bf16.mxu1 %v3830_v45 }
 0x613   :  { %1530 = vmatmul.mubr.bf16.vlgmr.msra.gmra.mrb[28].mxu0 %v1492_v54  ;;  %1540 = vmatprep.subr.bf16.mxu1 %v3599_v37 }
 0x614   :  { %2507 = vmatpush3.bf16.msra.mxu0 %v2860_v7  ;;  %2323 = vmatprep.mubr.msk.f32.mxu0 %vm2802_vm0, %v3831_v51 }
 0x615   :  { %2508 = vmatprep.subr.bf16.mxu0 %v3832_v43 }
 0x616   :  { %1541 = vmatpush1.bf16.msra.mxu1 %v3609_v8 }
 0x617   :  { %1542 = vmatprep.subr.bf16.mxu1 %v3615_v25 }
 0x618   :  { %2510 = vmatpush3.bf16.msra.mxu0 %v2882_v13 }
 0x619   :  { %2511 = vmatprep.subr.bf16.mxu0 %v3832_v43 }
 0x61a   :  { %1543 = vmatpush1.bf16.msra.mxu1 %v3623_v29 }
 0x61b   :  { %1544 = vmatprep.subr.bf16.mxu1 %v3629_v24 }
 0x61c   :  { %2513 = vmatpush3.bf16.msra.mxu0 %v2904_v18 }
 0x61d   :  { %2514 = vmatprep.subr.bf16.mxu0 %v3832_v43 }
 0x61e   :  { %1545 = vmatpush1.bf16.msra.mxu1 %v3637_v36 }
 0x61f   :  { %1546 = vmatprep.subr.bf16.mxu1 %v3643_v9 }
 0x620   :  { %2516 = vmatpush3.bf16.msra.mxu0 %v2926_v23 }
 0x621   :  { %2517 = vmatprep.subr.bf16.mxu0 %v3832_v43 }
 0x622   :  { %1547 = vmatpush1.bf16.msra.mxu1 %v3651_v21 }
 0x623   :  { %1548 = vmatprep.subr.bf16.mxu1 %v3657_v26 }
 0x624   :  { %2519 = vmatpush3.bf16.msra.mxu0 %v2948_v28 }
 0x625   :  { %2520 = vmatprep.subr.bf16.mxu0 %v3832_v43 }
 0x626   :  { %1549 = vmatpush1.bf16.msra.mxu1 %v3665_v27 }
 0x627   :  { %1550 = vmatprep.subr.bf16.mxu1 %v3671_v31 }
 0x628   :  { %2522 = vmatpush3.bf16.msra.mxu0 %v2975_v34 }
 0x629   :  { %2523 = vmatprep.subr.bf16.mxu0 %v3832_v43 }
 0x62a   :  { %1551 = vmatpush1.bf16.msra.mxu1 %v3679_v50 }
 0x62b   :  { %1552 = vmatprep.subr.bf16.mxu1 %v3685_v32 }
 0x62c   :  { %2525 = vmatpush3.bf16.msra.mxu0 %v2993_v39 }
 0x62d   :  { %2526 = vmatprep.subr.bf16.mxu0 %v3832_v43 }
 0x62e   :  { %1553 = vmatpush1.bf16.msra.mxu1 %v3693_v40 }
 0x62f   :  { %1689 = vmatprep.subr.bf16.mxu1 %v3403_v42  ;;  %v66_v42 = vpop.permute.xlu0 %65 }
 0x630   :  { %2528 = vmatpush3.bf16.msra.mxu0 %v3015_v44  ;;  %v120_v19 = vmul.f32 %v3062_v11, %v66_v42  ;;  %v121_v30 = vmul.f32 %v3055_v62, %v66_v42 }
 0x631   :  { %1571 = vmatmul.mubr.bf16.vlgmr.msra.gmra.mrb[28].mxu1 %v1492_v54  ;;  %1730 = vmatprep.subr.bf16.mxu0 %v3508_v56  ;;  %v118_v56 = vmul.f32 %v3847_v10, %v66_v42 }
 0x632   :  { %1690 = vmatpush1.bf16.msra.mxu1 %v3411_v0  ;;  %1721 = vmatprep.mubr.bf16.mxu1 %v3830_v45  ;;  %v174_v61 = vadd.f32 %v3065_v16, %v120_v19 }
 0x633   :  { %1691 = vmatprep.subr.bf16.mxu1 %v3418_v47  ;;  %v3719_v47 = vld [vmem:[%s3792_s5] ss:$0 sm:$0xff] }
 0x636   :  { %1692 = vmatpush1.bf16.msra.mxu1 %v3424_v46 }
 0x637   :  { %1693 = vmatprep.subr.bf16.mxu1 %v3430_v48 }
 0x63a   :  { %1694 = vmatpush1.bf16.msra.mxu1 %v3436_v52  ;;  %v119_v52 = vmul.f32 %v3845_v55, %v66_v42 }
 0x63b   :  { %1695 = vmatprep.subr.bf16.mxu1 %v3442_v41 }
 0x63e   :  { %1696 = vmatpush1.bf16.msra.mxu1 %v3521_v60 }
 0x63f   :  { %1697 = vmatprep.subr.bf16.mxu1 %v3527_v63 }
 0x642   :  { %1698 = vmatpush1.bf16.msra.mxu1 %v3533_v1 }
 0x643   :  { %1699 = vmatprep.subr.bf16.mxu1 %v3539_v2 }
 0x646   :  { %1700 = vmatpush1.bf16.msra.mxu1 %v3545_v3  ;;  %v173_v3 = vadd.f32 %v3051_v58, %v119_v52 }
 0x647   :  { %1701 = vmatprep.subr.bf16.mxu1 %v3551_v4  ;;  %v172_v4 = vadd.f32 %v3049_v57, %v118_v56 }
 0x64a   :  { %1702 = vmatpush1.bf16.msra.mxu1 %v3557_v6 }
 0x64b   :  { %1703 = vmatprep.subr.bf16.mxu1 %v3563_v12 }
 0x64e   :  { %1704 = vmatpush1.bf16.msra.mxu1 %v3569_v17 }
 0x64f   :  { %2529 = vmatprep.subr.bf16.mxu1 %v3832_v43 }
 0x6e4   :  { %v1481_v0 = vpop.f32.mrb[24].mxu1 }
 0x6e5   :  { %v1482_v46 = vadd.f32 %v3719_v47, %v1481_v0  ;;  %v2290_v48 = vpop.f32.mrb[25].mxu1  ;;  %v175_v0 = vadd.f32 %v3059_v5, %v121_v30 }
 0x6e6   :  { %v1531_v41 = vpop.f32.mrb[28].mxu0 }
 0x6e7   :  { %v1936_v60 = vmul.f32 -1.442695, %v1482_v46  ;;  %v1533_v63 = vpop.f32.mrb[29].mxu0  ;;  %v1579_v12 = vadd.f32 %v1531_v41, %v172_v4 }
 0x6e8   :  { %v1535_v1 = vpop.f32.mrb[30].mxu0  ;;  %v1580_v6 = vadd.f32 %v1533_v63, %v173_v3 }
 0x6e9   :  { %2723 = vpow2.f32 %v1936_v60  ;;  %v1536_v2 = vpop.f32.mrb[31].mxu0  ;;  %v1937_v22 = vmul.f32 -1.442695, %v1579_v12 }
 0x6ea   :  { %v1938_v17 = vmul.f32 -1.442695, %v1580_v6 }
 0x6ec   :  { %2725 = vpow2.f32 %v1938_v17 }
 0x6ed   :  { %2727 = vpow2.f32 %v1937_v22 }
 0x6f3   :  { %v2724_v53 = vpop.eup %2723 }
 0x6f4   :  { %v1488_v20 = vadd.f32 1.0, %v2724_v53 }
 0x6f6   :  { %2729 = vrcp.f32 %v1488_v20  ;;  %v2726_v14 = vpop.eup %2725 }
 0x6f7   :  { %v2728_v15 = vpop.eup %2727  ;;  %v1592_v35 = vadd.f32 1.0, %v2726_v14 }
 0x6f8   :  { %v1586_v49 = vadd.f32 1.0, %v2728_v15 }
 0x6f9   :  { %2731 = vrcp.f32 %v1592_v35 }
 0x6fa   :  { %2733 = vrcp.f32 %v1586_v49 }
 0x700   :  { %v2730_v38 = vpop.eup %2729 }
 0x701   :  { %1491 = vst [vmem:[%s3793_s6 + $0x28] sm:$0xff] %v2730_v38 }
 0x703   :  { %v2732_v60 = vpop.eup %2731 }
 0x704   :  { %v1572_v54 = vpop.f32.mrb[28].mxu1  ;;  %v2734_v63 = vpop.eup %2733  ;;  %v1602_v2 = vmul.f32 %v2732_v60, %v3586_v59 }
 0x705   :  { %v1581_v46 = vadd.f32 %v1572_v54, %v174_v61  ;;  %v1574_v48 = vpop.f32.mrb[29].mxu1 }
 0x706   :  { %v1582_v52 = vadd.f32 %v1574_v48, %v175_v0  ;;  %v1576_v41 = vpop.f32.mrb[30].mxu1 }
 0x707   :  { %2735 = vtanh.f32 %v1581_v46  ;;  %v1577_v56 = vpop.f32.mrb[31].mxu1 }
 0x708   :  { %v1939_v42 = vmul.f32 -1.442695, %v1582_v52 }
 0x70a   :  { %2737 = vpow2.f32 %v1939_v42 }
 0x711   :  { %v2736_v1 = vpop.eup %2735 }
 0x712   :  { %v1603_v3 = vmul.f32 %v2736_v1, %v2734_v63 }
 0x714   :  { %v2738_v4 = vpop.eup %2737  ;;  %v3734_v6 = vadd.f32 %v1603_v3, %v1602_v2 }
 0x715   :  { %v1599_v12 = vadd.f32 1.0, %v2738_v4 }
 0x716   :  { %2739 = vtanh.f32 %v3734_v6 }
 0x717   :  { %2741 = vrcp.f32 %v1599_v12 }
 0x720   :  { %v2740_v17 = vpop.eup %2739 }
 0x721   :  { %v2742_v22 = vpop.eup %2741 }
 0x722   :  { %v1606_v53 = vmul.f32 %v2742_v22, %v2740_v17 }
 0x724   :  { %2324 = vmatmul.mubr.f32.vlgmr.msra.gmra.mrb[22].mxu0 %v1606_v53  ;;  %v1684_v20 = vpack.c.bf16 %v1606_v53, %v1606_v53 }
 0x725   :  { %1731 = vmatpush1.bf16.msra.mxu0 %v3592_v33  ;;  %1762 = vmatprep.mubr.bf16.mxu0 %v3830_v45 }
 0x726   :  { %1722 = vmatmul.mubr.bf16.vlgmr.msra.gmra.mrb[32].mxu1 %v1684_v20  ;;  %1732 = vmatprep.subr.bf16.mxu0 %v3599_v37 }
 0x727   :  { %2531 = vmatpush3.bf16.msra.mxu1 %v2860_v7  ;;  %2358 = vmatprep.mubr.msk.f32.mxu1 %vm2802_vm0, %v3831_v51  ;;  %v71_v7 = vpop.permute.xlu1 %70 }
 0x728   :  { %2532 = vmatprep.subr.bf16.mxu1 %v3832_v43  ;;  %v122_v45 = vmul.f32 %v3847_v10, %v71_v7 }
 0x729   :  { %1733 = vmatpush1.bf16.msra.mxu0 %v3609_v8 }
 0x72a   :  { %1734 = vmatprep.subr.bf16.mxu0 %v3615_v25 }
 0x72b   :  { %2534 = vmatpush3.bf16.msra.mxu1 %v2882_v13 }
 0x72c   :  { %2535 = vmatprep.subr.bf16.mxu1 %v3832_v43 }
 0x72d   :  { %1735 = vmatpush1.bf16.msra.mxu0 %v3623_v29 }
 0x72e   :  { %1736 = vmatprep.subr.bf16.mxu0 %v3629_v24 }
 0x72f   :  { %2537 = vmatpush3.bf16.msra.mxu1 %v2904_v18 }
 0x730   :  { %2538 = vmatprep.subr.bf16.mxu1 %v3832_v43 }
 0x731   :  { %1737 = vmatpush1.bf16.msra.mxu0 %v3637_v36 }
 0x732   :  { %1738 = vmatprep.subr.bf16.mxu0 %v3643_v9  ;;  %v124_v9 = vmul.f32 %v3062_v11, %v71_v7 }
 0x733   :  { %2540 = vmatpush3.bf16.msra.mxu1 %v2926_v23 }
 0x734   :  { %2541 = vmatprep.subr.bf16.mxu1 %v3832_v43 }
 0x735   :  { %1739 = vmatpush1.bf16.msra.mxu0 %v3651_v21 }
 0x736   :  { %1740 = vmatprep.subr.bf16.mxu0 %v3657_v26  ;;  %v125_v26 = vmul.f32 %v3055_v62, %v71_v7 }
 0x737   :  { %2543 = vmatpush3.bf16.msra.mxu1 %v2948_v28  ;;  %v123_v28 = vmul.f32 %v3845_v55, %v71_v7 }
 0x738   :  { %2544 = vmatprep.subr.bf16.mxu1 %v3832_v43 }
 0x739   :  { %1741 = vmatpush1.bf16.msra.mxu0 %v3665_v27  ;;  %v177_v33 = vadd.f32 %v3051_v58, %v123_v28  ;;  %v178_v27 = vadd.f32 %v3065_v16, %v124_v9 }
 0x73a   :  { %1742 = vmatprep.subr.bf16.mxu0 %v3671_v31 }
 0x73b   :  { %2546 = vmatpush3.bf16.msra.mxu1 %v2975_v34 }
 0x73c   :  { %2547 = vmatprep.subr.bf16.mxu1 %v3832_v43 }
 0x73d   :  { %1743 = vmatpush1.bf16.msra.mxu0 %v3679_v50  ;;  %v179_v50 = vadd.f32 %v3059_v5, %v125_v26 }
 0x73e   :  { %1744 = vmatprep.subr.bf16.mxu0 %v3685_v32 }
 0x73f   :  { %2549 = vmatpush3.bf16.msra.mxu1 %v2993_v39 }
 0x740   :  { %2550 = vmatprep.subr.bf16.mxu1 %v3832_v43 }
 0x741   :  { %1745 = vmatpush1.bf16.msra.mxu0 %v3693_v40 }
 0x743   :  { %2552 = vmatpush3.bf16.msra.mxu1 %v3015_v44  ;;  %v176_v44 = vadd.f32 %v3049_v57, %v122_v45 }
 0x744   :  { %1763 = vmatmul.mubr.bf16.vlgmr.msra.gmra.mrb[32].mxu0 %v1684_v20 }
 0x7f7   :  { %v1673_v13 = vpop.f32.mrb[22].mxu0 }
 0x7f8   :  { %v1674_v18 = vadd.f32 %v3719_v47, %v1673_v13  ;;  %v2325_v23 = vpop.f32.mrb[23].mxu0 }
 0x7f9   :  { %v1723_v34 = vpop.f32.mrb[32].mxu1 }
 0x7fa   :  { %v1940_v51 = vmul.f32 -1.442695, %v1674_v18  ;;  %v1725_v59 = vpop.f32.mrb[33].mxu1  ;;  %v1771_v8 = vadd.f32 %v1723_v34, %v176_v44 }
 0x7fb   :  { %v1727_v39 = vpop.f32.mrb[34].mxu1  ;;  %v1772_v37 = vadd.f32 %v1725_v59, %v177_v33 }
 0x7fc   :  { %2743 = vpow2.f32 %v1940_v51  ;;  %v1728_v43 = vpop.f32.mrb[35].mxu1  ;;  %v1941_v29 = vmul.f32 -1.442695, %v1771_v8 }
 0x7fd   :  { %v1942_v25 = vmul.f32 -1.442695, %v1772_v37 }
 0x7ff   :  { %2745 = vpow2.f32 %v1942_v25 }
 0x800   :  { %2747 = vpow2.f32 %v1941_v29 }
 0x806   :  { %v2744_v24 = vpop.eup %2743 }
 0x807   :  { %v1680_v36 = vadd.f32 1.0, %v2744_v24 }
 0x809   :  { %2749 = vrcp.f32 %v1680_v36  ;;  %v2746_v55 = vpop.eup %2745 }
 0x80a   :  { %v2748_v10 = vpop.eup %2747  ;;  %v1784_v57 = vadd.f32 1.0, %v2746_v55 }
 0x80b   :  { %v1778_v58 = vadd.f32 1.0, %v2748_v10 }
 0x80c   :  { %2751 = vrcp.f32 %v1784_v57 }
 0x80d   :  { %2753 = vrcp.f32 %v1778_v58 }
 0x813   :  { %v2750_v21 = vpop.eup %2749 }
 0x814   :  { %1683 = vst [vmem:[%s3793_s6 + $0x30] sm:$0xff] %v2750_v21 }
 0x816   :  { %v2752_v19 = vpop.eup %2751 }
 0x817   :  { %v1764_v31 = vpop.f32.mrb[32].mxu0  ;;  %v2754_v38 = vpop.eup %2753  ;;  %v1794_v35 = vmul.f32 %v2752_v19, %v3734_v6 }
 0x818   :  { %v1773_v32 = vadd.f32 %v1764_v31, %v178_v27  ;;  %v1766_v40 = vpop.f32.mrb[33].mxu0 }
 0x819   :  { %v1774_v14 = vadd.f32 %v1766_v40, %v179_v50  ;;  %v1768_v11 = vpop.f32.mrb[34].mxu0 }
 0x81a   :  { %2755 = vtanh.f32 %v1773_v32  ;;  %v1769_v15 = vpop.f32.mrb[35].mxu0 }
 0x81b   :  { %v1943_v62 = vmul.f32 -1.442695, %v1774_v14 }
 0x81d   :  { %2757 = vpow2.f32 %v1943_v62 }
 0x824   :  { %v2756_v30 = vpop.eup %2755 }
 0x825   :  { %v1795_v49 = vmul.f32 %v2756_v30, %v2754_v38 }
 0x827   :  { %v2758_v16 = vpop.eup %2757  ;;  %v1796_v61 = vadd.f32 %v1795_v49, %v1794_v35 }
 0x828   :  { %v1791_v54 = vadd.f32 1.0, %v2758_v16 }
 0x829   :  { %2759 = vtanh.f32 %v1796_v61 }
 0x82a   :  { %2761 = vrcp.f32 %v1791_v54 }
 0x833   :  { %v2760_v5 = vpop.eup %2759 }
 0x834   :  { %v2762_v0 = vpop.eup %2761 }
 0x835   :  { %v1798_v46 = vmul.f32 %v2762_v0, %v2760_v5 }
 0x837   :  { %2359 = vmatmul.mubr.f32.vlgmr.msra.gmra.mrb[26].mxu1 %v1798_v46 }
 0x90a   :  { %v1865_v48 = vpop.f32.mrb[26].mxu1 }
 0x90b   :  { %v1866_v52 = vadd.f32 %v3719_v47, %v1865_v48  ;;  %v2360_v41 = vpop.f32.mrb[27].mxu1 }
 0x90d   :  { %v1944_v56 = vmul.f32 -1.442695, %v1866_v52 }
 0x90f   :  { %2763 = vpow2.f32 %v1944_v56 }
 0x919   :  { %v2764_v42 = vpop.eup %2763 }
 0x91a   :  { %v1872_v60 = vadd.f32 1.0, %v2764_v42 }
 0x91c   :  { %2765 = vrcp.f32 %v1872_v60 }
 0x926   :  { %v2766_v63 = vpop.eup %2765 }
 0x927   :  { %1875 = vst [vmem:[%s3793_s6 + $0x38] sm:$0xff] %v2766_v63 }

</bundles_post_ra>
